<compile_context>
chip_gen: v5e
topology: v5e:2x2
jax: 0.10.0
libtpu: 0.0.40
codegen_flags: <defaults>
</compile_context>

<pallas_src>
import functools

import jax
import jax.numpy as jnp
import numpy as np
from jax import lax
from jax.experimental import pallas as pl
from jax.experimental.pallas import tpu as pltpu

EPS = 1e-5  # torch nn.LayerNorm default


def _layernorm(x, gamma, beta):
    mu = jnp.mean(x, axis=-1, keepdims=True)
    var = jnp.mean((x - mu) ** 2, axis=-1, keepdims=True)  # biased variance, like torch
    return (x - mu) * lax.rsqrt(var + EPS) * gamma + beta


def enc_block_kernel(x_ref, gamma_ref, beta_ref,
                     wqkv_ref, bqkv_ref,
                     w1_ref, b1_ref, w2_ref, b2_ref,
                     o_ref, *, num_head, seq_len):
    x = x_ref[...]                     # (Rt, E) f32 ; Rt = Bt * seq_len rows this step
    gamma = gamma_ref[...]             # (1, E) f32
    beta = beta_ref[...]               # (1, E) f32
    Rt, E = x.shape
    N = seq_len
    Bt = Rt // N
    hd = E // num_head

    # ---------------- x + att(ll(x)) ----------------
    ln1 = _layernorm(x, gamma, beta)                                   # f32
    # Fused QKV projection: one (Rt,E)x(E,3E) bf16 MXU matmul, f32 accumulation.
    qkv = jnp.dot(ln1.astype(jnp.bfloat16), wqkv_ref[...],
                  preferred_element_type=jnp.float32) + bqkv_ref[...]  # (Rt, 3E) f32
    # NOTE: the 1/sqrt(num_head) attention scale is pre-folded into the Q weight/bias.
    q = qkv[:, 0 * E:1 * E].astype(jnp.bfloat16)
    k = qkv[:, 1 * E:2 * E].astype(jnp.bfloat16)
    v = qkv[:, 2 * E:3 * E].astype(jnp.bfloat16)

    # Scores for every (batch, head) pair; contraction on the last dims (no K transpose).
    dn = (((1,), (1,)), ((), ()))
    scores = []
    for b in range(Bt):                # static unroll; Bt, num_head are small
        qb = q[b * N:(b + 1) * N, :]
        kb = k[b * N:(b + 1) * N, :]
        for h in range(num_head):
            scores.append(lax.dot_general(
                qb[:, h * hd:(h + 1) * hd], kb[:, h * hd:(h + 1) * hd], dn,
                preferred_element_type=jnp.float32))                  # (N, N) f32
    s = jnp.concatenate(scores, axis=1)                               # (N, Bt*H*N)

    # F.softmax(wei, dim=2) on (b, h, n_q, n_k) normalizes over the *query* axis, i.e. axis 0
    # of every (Nq, Nk) column tile -> one fused softmax over the whole lane-concat array.
    s = jnp.exp(s - jnp.max(s, axis=0, keepdims=True))
    p = (s * pl.reciprocal(jnp.sum(s, axis=0, keepdims=True), approx=True)
         ).astype(jnp.bfloat16)

    att_slabs = []
    for b in range(Bt):
        vb = v[b * N:(b + 1) * N, :]
        outs = []
        for h in range(num_head):
            col = (b * num_head + h) * N
            outs.append(jnp.dot(p[:, col:col + N], vb[:, h * hd:(h + 1) * hd],
                                preferred_element_type=jnp.float32))  # (N, hd) f32
        att_slabs.append(jnp.concatenate(outs, axis=1))               # (N, E) lane-dense
    att = jnp.concatenate(att_slabs, axis=0)                          # (Rt, E)

    x1 = x + att                       # dropout == identity at inference

    # ---------------- x + ff(ll(x)) ----------------  (same LayerNorm params, as in module)
    ln2 = _layernorm(x1, gamma, beta)
    hid = jnp.dot(ln2.astype(jnp.bfloat16), w1_ref[...],
                  preferred_element_type=jnp.float32) + b1_ref[...]   # (Rt, 4E) f32
    ff = jnp.dot(hid.astype(jnp.bfloat16), w2_ref[...],
                 preferred_element_type=jnp.float32) + b2_ref[...]    # (Rt, E)  f32

    o_ref[...] = (x1 + ff).astype(o_ref.dtype)


def enc_block(x, params, num_head, *, target_rows=256):
    B, N, E = x.shape
    (gamma, beta, wq, bq, wk, bk, wv, bv, w1, b1, w2, b2) = params
    assert E % num_head == 0, "emb_size must be divisible by num_head"

    # ---- one-time parameter prep (done once, outside the kernel hot path) ----
    scale = 1.0 / (num_head ** 0.5)
    wqkv = jnp.concatenate([wq * scale, wk, wv], axis=1).astype(jnp.bfloat16)  # (E, 3E)
    bqkv = jnp.concatenate([bq * scale, bk, bv], axis=1).astype(jnp.float32)   # (1, 3E)
    w1b = w1.astype(jnp.bfloat16)
    w2b = w2.astype(jnp.bfloat16)

    # ---- rows-per-step: fill the MXU M dimension (target >= 256 rows when possible) ----
    bt = max(1, min(B, max(1, target_rows // N)))
    while B % bt != 0:
        bt -= 1
    rt = bt * N
    steps = B // bt
    if steps > 1 and rt % 8 != 0:      # sublane (8) constraint on multi-step row blocks
        bt, rt, steps = B, B * N, 1

    xr = x.reshape(B * N, E)           # wrapper-side collapse of (B, N) into the matmul M dim

    def wfull(shape):                  # resident weight: constant block index -> fetched once
        return pl.BlockSpec(shape, lambda i, _n=len(shape): (0,) * _n)

    kernel = functools.partial(enc_block_kernel, num_head=num_head, seq_len=N)
    out = pl.pallas_call(
        kernel,
        out_shape=jax.ShapeDtypeStruct((B * N, E), x.dtype),
        grid=(steps,),
        in_specs=[
            pl.BlockSpec((rt, E), lambda i: (i, 0)),          # x rows: (Bt*N, E) per step
            wfull((1, E)), wfull((1, E)),                     # LayerNorm gamma / beta (f32)
            wfull((E, 3 * E)), wfull((1, 3 * E)),             # fused Wqkv (bf16), bqkv (f32)
            wfull((E, 4 * E)), wfull((1, 4 * E)),             # FF W1 (bf16), b1 (f32)
            wfull((4 * E, E)), wfull((1, E)),                 # FF W2 (bf16), b2 (f32)
        ],
        out_specs=pl.BlockSpec((rt, E), lambda i: (i, 0)),
        compiler_params=pltpu.CompilerParams(
            dimension_semantics=("parallel",),                # only matters when steps >= 2
            vmem_limit_bytes=48 * 1024 * 1024,                # < v7x 64 MiB; v6e can go higher
        ),
        # NOTE(v7x, large E): constant-index weight tiles are DMA'd only once; for E >= 1024
        # additionally single-buffer them (pipeline_mode=pl.Buffered(1)) and tile the FF
        # hidden over the 4E dim so the f32 intermediate stays within 64 MiB VMEM.
    )(xr, gamma, beta, wqkv, bqkv, w1b, b1, w2b, b2)
    return out.reshape(B, N, E)


# ---------------- pure-JAX f32 reference (mirrors the torch forward) ----------------
def enc_block_ref(x, params, num_head):
    (gamma, beta, wq, bq, wk, bk, wv, bv, w1, b1, w2, b2) = params
    B, N, E = x.shape
    hd = E // num_head

    def ln(y):
        mu = jnp.mean(y, axis=-1, keepdims=True)
        var = jnp.mean((y - mu) ** 2, axis=-1, keepdims=True)
        return (y - mu) / jnp.sqrt(var + EPS) * gamma + beta

    l1 = ln(x)
    q = (l1 @ wq + bq).reshape(B, N, num_head, hd).transpose(0, 2, 1, 3)
    k = (l1 @ wk + bk).reshape(B, N, num_head, hd).transpose(0, 2, 1, 3)
    v = (l1 @ wv + bv).reshape(B, N, num_head, hd).transpose(0, 2, 1, 3)
    wei = jnp.einsum("bhqd,bhkd->bhqk", q, k) / (num_head ** 0.5)
    wei = jax.nn.softmax(wei, axis=2)          # softmax over the query axis, as in torch code
    out = jnp.einsum("bhqk,bhkd->bhqd", wei, v)
    att = out.transpose(0, 2, 1, 3).reshape(B, N, E)
    x1 = x + att
    l2 = ln(x1)
    ff = (l2 @ w1 + b1) @ w2 + b2
    return x1 + ff


if __name__ == "__main__":
    # E chosen as a multiple of 128 so all matmul lane dims and the output store are dense.
    B, N, E, H = 2, 8, 128, 4
    key = jax.random.PRNGKey(0)
    keys = jax.random.split(key, 12)

    # Linear weights stored pre-transposed so the kernel computes y = x @ W + b
    # (equivalent to torch's x @ weight.T + bias).
    gamma = jnp.ones((1, E), jnp.float32)
    beta = jnp.zeros((1, E), jnp.float32)
    wq = jax.random.normal(keys[0], (E, E), jnp.float32) * 0.05
    bq = jax.random.normal(keys[1], (1, E), jnp.float32) * 0.05
    wk = jax.random.normal(keys[2], (E, E), jnp.float32) * 0.05
    bk = jax.random.normal(keys[3], (1, E), jnp.float32) * 0.05
    wv = jax.random.normal(keys[4], (E, E), jnp.float32) * 0.05
    bv = jax.random.normal(keys[5], (1, E), jnp.float32) * 0.05
    w1 = jax.random.normal(keys[6], (E, 4 * E), jnp.float32) * 0.05
    b1 = jax.random.normal(keys[7], (1, 4 * E), jnp.float32) * 0.05
    w2 = jax.random.normal(keys[8], (4 * E, E), jnp.float32) * 0.05
    b2 = jax.random.normal(keys[9], (1, E), jnp.float32) * 0.05
    params = (gamma, beta, wq, bq, wk, bk, wv, bv, w1, b1, w2, b2)

    x = jax.random.normal(keys[10], (B, N, E), jnp.float32)

    out = enc_block(x, params, H)
    jax.block_until_ready(out)

    ref = enc_block_ref(x, params, H)
    # bf16 MXU inputs (with f32 accumulation) + approx reciprocal => ~1e-2-level deviation.
    np.testing.assert_allclose(np.asarray(out), np.asarray(ref), rtol=3e-2, atol=3e-2)
    print("KERNEL_OK")
</pallas_src>

<mosaic_0001>
module attributes {stable_mosaic.version = 11 : i64} {
  func.func @enc_block_kernel(%arg0: i32, %arg1: memref<16x128xf32, #tpu.memory_space<vmem>>, %arg2: memref<1x128xf32, #tpu.memory_space<vmem>>, %arg3: memref<1x128xf32, #tpu.memory_space<vmem>>, %arg4: memref<128x384xbf16, #tpu.memory_space<vmem>>, %arg5: memref<1x384xf32, #tpu.memory_space<vmem>>, %arg6: memref<128x512xbf16, #tpu.memory_space<vmem>>, %arg7: memref<1x512xf32, #tpu.memory_space<vmem>>, %arg8: memref<512x128xbf16, #tpu.memory_space<vmem>>, %arg9: memref<1x128xf32, #tpu.memory_space<vmem>>, %arg10: memref<16x128xf32, #tpu.memory_space<vmem>>) attributes {dimension_semantics = [#tpu.dimension_semantics<parallel>], iteration_bounds = array<i64: 1>, scalar_prefetch = 0 : i64, scratch_operands = 0 : i64, tpu.core_type = #tpu.core_type<tc>, window_params = [{transform_indices = @transform_0, window_bounds = array<i64: 16, 128>}, {pipeline_mode = #tpu.pipeline_mode<synchronous>, transform_indices = @transform_1, window_bounds = array<i64: 1, 128>}, {pipeline_mode = #tpu.pipeline_mode<synchronous>, transform_indices = @transform_2, window_bounds = array<i64: 1, 128>}, {pipeline_mode = #tpu.pipeline_mode<synchronous>, transform_indices = @transform_3, window_bounds = array<i64: 128, 384>}, {pipeline_mode = #tpu.pipeline_mode<synchronous>, transform_indices = @transform_4, window_bounds = array<i64: 1, 384>}, {pipeline_mode = #tpu.pipeline_mode<synchronous>, transform_indices = @transform_5, window_bounds = array<i64: 128, 512>}, {pipeline_mode = #tpu.pipeline_mode<synchronous>, transform_indices = @transform_6, window_bounds = array<i64: 1, 512>}, {pipeline_mode = #tpu.pipeline_mode<synchronous>, transform_indices = @transform_7, window_bounds = array<i64: 512, 128>}, {pipeline_mode = #tpu.pipeline_mode<synchronous>, transform_indices = @transform_8, window_bounds = array<i64: 1, 128>}, {transform_indices = @transform_9, window_bounds = array<i64: 16, 128>}]} {
    %c0 = arith.constant 0 : index
    %c0_0 = arith.constant 0 : index
    %0 = vector.load %arg1[%c0, %c0_0] : memref<16x128xf32, #tpu.memory_space<vmem>>, vector<16x128xf32>
    %c0_1 = arith.constant 0 : index
    %c0_2 = arith.constant 0 : index
    %1 = vector.load %arg2[%c0_1, %c0_2] : memref<1x128xf32, #tpu.memory_space<vmem>>, vector<1x128xf32>
    %c0_3 = arith.constant 0 : index
    %c0_4 = arith.constant 0 : index
    %2 = vector.load %arg3[%c0_3, %c0_4] : memref<1x128xf32, #tpu.memory_space<vmem>>, vector<1x128xf32>
    %cst = arith.constant dense<0.000000e+00> : vector<16xf32>
    %3 = vector.multi_reduction <add>, %0, %cst [1] : vector<16x128xf32> to vector<16xf32>
    %4 = vector.shape_cast %3 : vector<16xf32> to vector<16x1xf32>
    %cst_5 = arith.constant 1.280000e+02 : f32
    %5 = vector.broadcast %cst_5 : f32 to vector<16x1xf32>
    %6 = arith.divf %4, %5 : vector<16x1xf32>
    %7 = vector.broadcast %6 : vector<16x1xf32> to vector<16x128xf32>
    %8 = arith.subf %0, %7 : vector<16x128xf32>
    %9 = arith.mulf %8, %8 : vector<16x128xf32>
    %cst_6 = arith.constant dense<0.000000e+00> : vector<16xf32>
    %10 = vector.multi_reduction <add>, %9, %cst_6 [1] : vector<16x128xf32> to vector<16xf32>
    %11 = vector.shape_cast %10 : vector<16xf32> to vector<16x1xf32>
    %cst_7 = arith.constant 1.280000e+02 : f32
    %12 = vector.broadcast %cst_7 : f32 to vector<16x1xf32>
    %13 = arith.divf %11, %12 : vector<16x1xf32>
    %14 = vector.broadcast %6 : vector<16x1xf32> to vector<16x128xf32>
    %15 = arith.subf %0, %14 : vector<16x128xf32>
    %cst_8 = arith.constant 9.99999974E-6 : f32
    %16 = vector.broadcast %cst_8 : f32 to vector<16x1xf32>
    %17 = arith.addf %13, %16 : vector<16x1xf32>
    %18 = math.rsqrt %17 : vector<16x1xf32>
    %19 = vector.broadcast %18 : vector<16x1xf32> to vector<16x128xf32>
    %20 = arith.mulf %15, %19 : vector<16x128xf32>
    %21 = vector.broadcast %1 : vector<1x128xf32> to vector<16x128xf32>
    %22 = arith.mulf %20, %21 : vector<16x128xf32>
    %23 = vector.broadcast %2 : vector<1x128xf32> to vector<16x128xf32>
    %24 = arith.addf %22, %23 : vector<16x128xf32>
    %25 = arith.truncf %24 : vector<16x128xf32> to vector<16x128xbf16>
    %c0_9 = arith.constant 0 : index
    %c0_10 = arith.constant 0 : index
    %26 = vector.load %arg4[%c0_9, %c0_10] : memref<128x384xbf16, #tpu.memory_space<vmem>>, vector<128x384xbf16>
    %cst_11 = arith.constant dense<0.000000e+00> : vector<16x384xf32>
    %27 = tpu.matmul %25, %26, %cst_11 {dimension_numbers = #tpu.dot_dimension_numbers<[1], [0], [0], [1], [0, 0, 1, 1], [], []>} : vector<16x128xbf16>, vector<128x384xbf16>, vector<16x384xf32> -> vector<16x384xf32>
    %c0_12 = arith.constant 0 : index
    %c0_13 = arith.constant 0 : index
    %28 = vector.load %arg5[%c0_12, %c0_13] : memref<1x384xf32, #tpu.memory_space<vmem>>, vector<1x384xf32>
    %29 = vector.broadcast %28 : vector<1x384xf32> to vector<16x384xf32>
    %30 = arith.addf %27, %29 : vector<16x384xf32>
    %31 = vector.extract_strided_slice %30 {offsets = [0, 0], sizes = [16, 128], strides = [1, 1]} : vector<16x384xf32> to vector<16x128xf32>
    %32 = arith.truncf %31 : vector<16x128xf32> to vector<16x128xbf16>
    %33 = vector.extract_strided_slice %30 {offsets = [0, 128], sizes = [16, 128], strides = [1, 1]} : vector<16x384xf32> to vector<16x128xf32>
    %34 = arith.truncf %33 : vector<16x128xf32> to vector<16x128xbf16>
    %35 = vector.extract_strided_slice %30 {offsets = [0, 256], sizes = [16, 128], strides = [1, 1]} : vector<16x384xf32> to vector<16x128xf32>
    %36 = arith.truncf %35 : vector<16x128xf32> to vector<16x128xbf16>
    %37 = vector.extract_strided_slice %32 {offsets = [0, 0], sizes = [8, 128], strides = [1, 1]} : vector<16x128xbf16> to vector<8x128xbf16>
    %38 = vector.extract_strided_slice %34 {offsets = [0, 0], sizes = [8, 128], strides = [1, 1]} : vector<16x128xbf16> to vector<8x128xbf16>
    %39 = vector.extract_strided_slice %37 {offsets = [0, 0], sizes = [8, 32], strides = [1, 1]} : vector<8x128xbf16> to vector<8x32xbf16>
    %40 = vector.extract_strided_slice %38 {offsets = [0, 0], sizes = [8, 32], strides = [1, 1]} : vector<8x128xbf16> to vector<8x32xbf16>
    %cst_14 = arith.constant dense<0.000000e+00> : vector<8x8xf32>
    %41 = tpu.matmul %39, %40, %cst_14 {dimension_numbers = #tpu.dot_dimension_numbers<[1], [1], [0], [0], [0, 0, 1, 0], [], []>} : vector<8x32xbf16>, vector<8x32xbf16>, vector<8x8xf32> -> vector<8x8xf32>
    %42 = vector.extract_strided_slice %37 {offsets = [0, 32], sizes = [8, 32], strides = [1, 1]} : vector<8x128xbf16> to vector<8x32xbf16>
    %43 = vector.extract_strided_slice %38 {offsets = [0, 32], sizes = [8, 32], strides = [1, 1]} : vector<8x128xbf16> to vector<8x32xbf16>
    %cst_15 = arith.constant dense<0.000000e+00> : vector<8x8xf32>
    %44 = tpu.matmul %42, %43, %cst_15 {dimension_numbers = #tpu.dot_dimension_numbers<[1], [1], [0], [0], [0, 0, 1, 0], [], []>} : vector<8x32xbf16>, vector<8x32xbf16>, vector<8x8xf32> -> vector<8x8xf32>
    %45 = vector.extract_strided_slice %37 {offsets = [0, 64], sizes = [8, 32], strides = [1, 1]} : vector<8x128xbf16> to vector<8x32xbf16>
    %46 = vector.extract_strided_slice %38 {offsets = [0, 64], sizes = [8, 32], strides = [1, 1]} : vector<8x128xbf16> to vector<8x32xbf16>
    %cst_16 = arith.constant dense<0.000000e+00> : vector<8x8xf32>
    %47 = tpu.matmul %45, %46, %cst_16 {dimension_numbers = #tpu.dot_dimension_numbers<[1], [1], [0], [0], [0, 0, 1, 0], [], []>} : vector<8x32xbf16>, vector<8x32xbf16>, vector<8x8xf32> -> vector<8x8xf32>
    %48 = vector.extract_strided_slice %37 {offsets = [0, 96], sizes = [8, 32], strides = [1, 1]} : vector<8x128xbf16> to vector<8x32xbf16>
    %49 = vector.extract_strided_slice %38 {offsets = [0, 96], sizes = [8, 32], strides = [1, 1]} : vector<8x128xbf16> to vector<8x32xbf16>
    %cst_17 = arith.constant dense<0.000000e+00> : vector<8x8xf32>
    %50 = tpu.matmul %48, %49, %cst_17 {dimension_numbers = #tpu.dot_dimension_numbers<[1], [1], [0], [0], [0, 0, 1, 0], [], []>} : vector<8x32xbf16>, vector<8x32xbf16>, vector<8x8xf32> -> vector<8x8xf32>
    %51 = vector.extract_strided_slice %32 {offsets = [8, 0], sizes = [8, 128], strides = [1, 1]} : vector<16x128xbf16> to vector<8x128xbf16>
    %52 = vector.extract_strided_slice %34 {offsets = [8, 0], sizes = [8, 128], strides = [1, 1]} : vector<16x128xbf16> to vector<8x128xbf16>
    %53 = vector.extract_strided_slice %51 {offsets = [0, 0], sizes = [8, 32], strides = [1, 1]} : vector<8x128xbf16> to vector<8x32xbf16>
    %54 = vector.extract_strided_slice %52 {offsets = [0, 0], sizes = [8, 32], strides = [1, 1]} : vector<8x128xbf16> to vector<8x32xbf16>
    %cst_18 = arith.constant dense<0.000000e+00> : vector<8x8xf32>
    %55 = tpu.matmul %53, %54, %cst_18 {dimension_numbers = #tpu.dot_dimension_numbers<[1], [1], [0], [0], [0, 0, 1, 0], [], []>} : vector<8x32xbf16>, vector<8x32xbf16>, vector<8x8xf32> -> vector<8x8xf32>
    %56 = vector.extract_strided_slice %51 {offsets = [0, 32], sizes = [8, 32], strides = [1, 1]} : vector<8x128xbf16> to vector<8x32xbf16>
    %57 = vector.extract_strided_slice %52 {offsets = [0, 32], sizes = [8, 32], strides = [1, 1]} : vector<8x128xbf16> to vector<8x32xbf16>
    %cst_19 = arith.constant dense<0.000000e+00> : vector<8x8xf32>
    %58 = tpu.matmul %56, %57, %cst_19 {dimension_numbers = #tpu.dot_dimension_numbers<[1], [1], [0], [0], [0, 0, 1, 0], [], []>} : vector<8x32xbf16>, vector<8x32xbf16>, vector<8x8xf32> -> vector<8x8xf32>
    %59 = vector.extract_strided_slice %51 {offsets = [0, 64], sizes = [8, 32], strides = [1, 1]} : vector<8x128xbf16> to vector<8x32xbf16>
    %60 = vector.extract_strided_slice %52 {offsets = [0, 64], sizes = [8, 32], strides = [1, 1]} : vector<8x128xbf16> to vector<8x32xbf16>
    %cst_20 = arith.constant dense<0.000000e+00> : vector<8x8xf32>
    %61 = tpu.matmul %59, %60, %cst_20 {dimension_numbers = #tpu.dot_dimension_numbers<[1], [1], [0], [0], [0, 0, 1, 0], [], []>} : vector<8x32xbf16>, vector<8x32xbf16>, vector<8x8xf32> -> vector<8x8xf32>
    %62 = vector.extract_strided_slice %51 {offsets = [0, 96], sizes = [8, 32], strides = [1, 1]} : vector<8x128xbf16> to vector<8x32xbf16>
    %63 = vector.extract_strided_slice %52 {offsets = [0, 96], sizes = [8, 32], strides = [1, 1]} : vector<8x128xbf16> to vector<8x32xbf16>
    %cst_21 = arith.constant dense<0.000000e+00> : vector<8x8xf32>
    %64 = tpu.matmul %62, %63, %cst_21 {dimension_numbers = #tpu.dot_dimension_numbers<[1], [1], [0], [0], [0, 0, 1, 0], [], []>} : vector<8x32xbf16>, vector<8x32xbf16>, vector<8x8xf32> -> vector<8x8xf32>
    %65 = tpu.concatenate %41, %44, %47, %50, %55, %58, %61, %64 in 1 : vector<8x8xf32>, vector<8x8xf32>, vector<8x8xf32>, vector<8x8xf32>, vector<8x8xf32>, vector<8x8xf32>, vector<8x8xf32>, vector<8x8xf32> -> vector<8x64xf32>
    %cst_22 = arith.constant dense<0xFF800000> : vector<64xf32>
    %66 = vector.multi_reduction <maximumf>, %65, %cst_22 [0] : vector<8x64xf32> to vector<64xf32>
    %67 = vector.shape_cast %66 : vector<64xf32> to vector<1x64xf32>
    %68 = vector.broadcast %67 : vector<1x64xf32> to vector<8x64xf32>
    %69 = arith.subf %65, %68 : vector<8x64xf32>
    %70 = math.exp %69 : vector<8x64xf32>
    %cst_23 = arith.constant dense<0.000000e+00> : vector<64xf32>
    %71 = vector.multi_reduction <add>, %70, %cst_23 [0] : vector<8x64xf32> to vector<64xf32>
    %72 = vector.shape_cast %71 : vector<64xf32> to vector<1x64xf32>
    %73 = tpu.reciprocal %72 {approx = true} : vector<1x64xf32> -> vector<1x64xf32>
    %74 = vector.broadcast %73 : vector<1x64xf32> to vector<8x64xf32>
    %75 = arith.mulf %70, %74 : vector<8x64xf32>
    %76 = arith.truncf %75 : vector<8x64xf32> to vector<8x64xbf16>
    %77 = vector.extract_strided_slice %36 {offsets = [0, 0], sizes = [8, 128], strides = [1, 1]} : vector<16x128xbf16> to vector<8x128xbf16>
    %78 = vector.extract_strided_slice %76 {offsets = [0, 0], sizes = [8, 8], strides = [1, 1]} : vector<8x64xbf16> to vector<8x8xbf16>
    %79 = vector.extract_strided_slice %77 {offsets = [0, 0], sizes = [8, 32], strides = [1, 1]} : vector<8x128xbf16> to vector<8x32xbf16>
    %cst_24 = arith.constant dense<0.000000e+00> : vector<8x32xf32>
    %80 = tpu.matmul %78, %79, %cst_24 {dimension_numbers = #tpu.dot_dimension_numbers<[1], [0], [0], [1], [0, 0, 1, 1], [], []>} : vector<8x8xbf16>, vector<8x32xbf16>, vector<8x32xf32> -> vector<8x32xf32>
    %81 = vector.extract_strided_slice %76 {offsets = [0, 8], sizes = [8, 8], strides = [1, 1]} : vector<8x64xbf16> to vector<8x8xbf16>
    %82 = vector.extract_strided_slice %77 {offsets = [0, 32], sizes = [8, 32], strides = [1, 1]} : vector<8x128xbf16> to vector<8x32xbf16>
    %cst_25 = arith.constant dense<0.000000e+00> : vector<8x32xf32>
    %83 = tpu.matmul %81, %82, %cst_25 {dimension_numbers = #tpu.dot_dimension_numbers<[1], [0], [0], [1], [0, 0, 1, 1], [], []>} : vector<8x8xbf16>, vector<8x32xbf16>, vector<8x32xf32> -> vector<8x32xf32>
    %84 = vector.extract_strided_slice %76 {offsets = [0, 16], sizes = [8, 8], strides = [1, 1]} : vector<8x64xbf16> to vector<8x8xbf16>
    %85 = vector.extract_strided_slice %77 {offsets = [0, 64], sizes = [8, 32], strides = [1, 1]} : vector<8x128xbf16> to vector<8x32xbf16>
    %cst_26 = arith.constant dense<0.000000e+00> : vector<8x32xf32>
    %86 = tpu.matmul %84, %85, %cst_26 {dimension_numbers = #tpu.dot_dimension_numbers<[1], [0], [0], [1], [0, 0, 1, 1], [], []>} : vector<8x8xbf16>, vector<8x32xbf16>, vector<8x32xf32> -> vector<8x32xf32>
    %87 = vector.extract_strided_slice %76 {offsets = [0, 24], sizes = [8, 8], strides = [1, 1]} : vector<8x64xbf16> to vector<8x8xbf16>
    %88 = vector.extract_strided_slice %77 {offsets = [0, 96], sizes = [8, 32], strides = [1, 1]} : vector<8x128xbf16> to vector<8x32xbf16>
    %cst_27 = arith.constant dense<0.000000e+00> : vector<8x32xf32>
    %89 = tpu.matmul %87, %88, %cst_27 {dimension_numbers = #tpu.dot_dimension_numbers<[1], [0], [0], [1], [0, 0, 1, 1], [], []>} : vector<8x8xbf16>, vector<8x32xbf16>, vector<8x32xf32> -> vector<8x32xf32>
    %90 = tpu.concatenate %80, %83, %86, %89 in 1 : vector<8x32xf32>, vector<8x32xf32>, vector<8x32xf32>, vector<8x32xf32> -> vector<8x128xf32>
    %91 = vector.extract_strided_slice %36 {offsets = [8, 0], sizes = [8, 128], strides = [1, 1]} : vector<16x128xbf16> to vector<8x128xbf16>
    %92 = vector.extract_strided_slice %76 {offsets = [0, 32], sizes = [8, 8], strides = [1, 1]} : vector<8x64xbf16> to vector<8x8xbf16>
    %93 = vector.extract_strided_slice %91 {offsets = [0, 0], sizes = [8, 32], strides = [1, 1]} : vector<8x128xbf16> to vector<8x32xbf16>
    %cst_28 = arith.constant dense<0.000000e+00> : vector<8x32xf32>
    %94 = tpu.matmul %92, %93, %cst_28 {dimension_numbers = #tpu.dot_dimension_numbers<[1], [0], [0], [1], [0, 0, 1, 1], [], []>} : vector<8x8xbf16>, vector<8x32xbf16>, vector<8x32xf32> -> vector<8x32xf32>
    %95 = vector.extract_strided_slice %76 {offsets = [0, 40], sizes = [8, 8], strides = [1, 1]} : vector<8x64xbf16> to vector<8x8xbf16>
    %96 = vector.extract_strided_slice %91 {offsets = [0, 32], sizes = [8, 32], strides = [1, 1]} : vector<8x128xbf16> to vector<8x32xbf16>
    %cst_29 = arith.constant dense<0.000000e+00> : vector<8x32xf32>
    %97 = tpu.matmul %95, %96, %cst_29 {dimension_numbers = #tpu.dot_dimension_numbers<[1], [0], [0], [1], [0, 0, 1, 1], [], []>} : vector<8x8xbf16>, vector<8x32xbf16>, vector<8x32xf32> -> vector<8x32xf32>
    %98 = vector.extract_strided_slice %76 {offsets = [0, 48], sizes = [8, 8], strides = [1, 1]} : vector<8x64xbf16> to vector<8x8xbf16>
    %99 = vector.extract_strided_slice %91 {offsets = [0, 64], sizes = [8, 32], strides = [1, 1]} : vector<8x128xbf16> to vector<8x32xbf16>
    %cst_30 = arith.constant dense<0.000000e+00> : vector<8x32xf32>
    %100 = tpu.matmul %98, %99, %cst_30 {dimension_numbers = #tpu.dot_dimension_numbers<[1], [0], [0], [1], [0, 0, 1, 1], [], []>} : vector<8x8xbf16>, vector<8x32xbf16>, vector<8x32xf32> -> vector<8x32xf32>
    %101 = vector.extract_strided_slice %76 {offsets = [0, 56], sizes = [8, 8], strides = [1, 1]} : vector<8x64xbf16> to vector<8x8xbf16>
    %102 = vector.extract_strided_slice %91 {offsets = [0, 96], sizes = [8, 32], strides = [1, 1]} : vector<8x128xbf16> to vector<8x32xbf16>
    %cst_31 = arith.constant dense<0.000000e+00> : vector<8x32xf32>
    %103 = tpu.matmul %101, %102, %cst_31 {dimension_numbers = #tpu.dot_dimension_numbers<[1], [0], [0], [1], [0, 0, 1, 1], [], []>} : vector<8x8xbf16>, vector<8x32xbf16>, vector<8x32xf32> -> vector<8x32xf32>
    %104 = tpu.concatenate %94, %97, %100, %103 in 1 : vector<8x32xf32>, vector<8x32xf32>, vector<8x32xf32>, vector<8x32xf32> -> vector<8x128xf32>
    %105 = tpu.concatenate %90, %104 in 0 : vector<8x128xf32>, vector<8x128xf32> -> vector<16x128xf32>
    %106 = arith.addf %0, %105 : vector<16x128xf32>
    %cst_32 = arith.constant dense<0.000000e+00> : vector<16xf32>
    %107 = vector.multi_reduction <add>, %106, %cst_32 [1] : vector<16x128xf32> to vector<16xf32>
    %108 = vector.shape_cast %107 : vector<16xf32> to vector<16x1xf32>
    %cst_33 = arith.constant 1.280000e+02 : f32
    %109 = vector.broadcast %cst_33 : f32 to vector<16x1xf32>
    %110 = arith.divf %108, %109 : vector<16x1xf32>
    %111 = vector.broadcast %110 : vector<16x1xf32> to vector<16x128xf32>
    %112 = arith.subf %106, %111 : vector<16x128xf32>
    %113 = arith.mulf %112, %112 : vector<16x128xf32>
    %cst_34 = arith.constant dense<0.000000e+00> : vector<16xf32>
    %114 = vector.multi_reduction <add>, %113, %cst_34 [1] : vector<16x128xf32> to vector<16xf32>
    %115 = vector.shape_cast %114 : vector<16xf32> to vector<16x1xf32>
    %cst_35 = arith.constant 1.280000e+02 : f32
    %116 = vector.broadcast %cst_35 : f32 to vector<16x1xf32>
    %117 = arith.divf %115, %116 : vector<16x1xf32>
    %118 = vector.broadcast %110 : vector<16x1xf32> to vector<16x128xf32>
    %119 = arith.subf %106, %118 : vector<16x128xf32>
    %cst_36 = arith.constant 9.99999974E-6 : f32
    %120 = vector.broadcast %cst_36 : f32 to vector<16x1xf32>
    %121 = arith.addf %117, %120 : vector<16x1xf32>
    %122 = math.rsqrt %121 : vector<16x1xf32>
    %123 = vector.broadcast %122 : vector<16x1xf32> to vector<16x128xf32>
    %124 = arith.mulf %119, %123 : vector<16x128xf32>
    %125 = vector.broadcast %1 : vector<1x128xf32> to vector<16x128xf32>
    %126 = arith.mulf %124, %125 : vector<16x128xf32>
    %127 = vector.broadcast %2 : vector<1x128xf32> to vector<16x128xf32>
    %128 = arith.addf %126, %127 : vector<16x128xf32>
    %129 = arith.truncf %128 : vector<16x128xf32> to vector<16x128xbf16>
    %c0_37 = arith.constant 0 : index
    %c0_38 = arith.constant 0 : index
    %130 = vector.load %arg6[%c0_37, %c0_38] : memref<128x512xbf16, #tpu.memory_space<vmem>>, vector<128x512xbf16>
    %cst_39 = arith.constant dense<0.000000e+00> : vector<16x512xf32>
    %131 = tpu.matmul %129, %130, %cst_39 {dimension_numbers = #tpu.dot_dimension_numbers<[1], [0], [0], [1], [0, 0, 1, 1], [], []>} : vector<16x128xbf16>, vector<128x512xbf16>, vector<16x512xf32> -> vector<16x512xf32>
    %c0_40 = arith.constant 0 : index
    %c0_41 = arith.constant 0 : index
    %132 = vector.load %arg7[%c0_40, %c0_41] : memref<1x512xf32, #tpu.memory_space<vmem>>, vector<1x512xf32>
    %133 = vector.broadcast %132 : vector<1x512xf32> to vector<16x512xf32>
    %134 = arith.addf %131, %133 : vector<16x512xf32>
    %135 = arith.truncf %134 : vector<16x512xf32> to vector<16x512xbf16>
    %c0_42 = arith.constant 0 : index
    %c0_43 = arith.constant 0 : index
    %136 = vector.load %arg8[%c0_42, %c0_43] : memref<512x128xbf16, #tpu.memory_space<vmem>>, vector<512x128xbf16>
    %cst_44 = arith.constant dense<0.000000e+00> : vector<16x128xf32>
    %137 = tpu.matmul %135, %136, %cst_44 {dimension_numbers = #tpu.dot_dimension_numbers<[1], [0], [0], [1], [0, 0, 1, 1], [], []>} : vector<16x512xbf16>, vector<512x128xbf16>, vector<16x128xf32> -> vector<16x128xf32>
    %c0_45 = arith.constant 0 : index
    %c0_46 = arith.constant 0 : index
    %138 = vector.load %arg9[%c0_45, %c0_46] : memref<1x128xf32, #tpu.memory_space<vmem>>, vector<1x128xf32>
    %139 = vector.broadcast %138 : vector<1x128xf32> to vector<16x128xf32>
    %140 = arith.addf %137, %139 : vector<16x128xf32>
    %141 = arith.addf %106, %140 : vector<16x128xf32>
    %c0_47 = arith.constant 0 : index
    %c0_48 = arith.constant 0 : index
    %142 = vector.load %arg10[%c0_47, %c0_48] : memref<16x128xf32, #tpu.memory_space<vmem>>, vector<16x128xf32>
    tpu.vector_store %arg10[%c0_47, %c0_48], %141 {strides = array<i32>} : memref<16x128xf32, #tpu.memory_space<vmem>>, vector<16x128xf32>,
    return
  }
  func.func @transform_0(%arg0: i32) -> (i32, i32) {
    %c0_i32 = arith.constant 0 : i32
    %c0_i32_0 = arith.constant 0 : i32
    return %arg0, %c0_i32 : i32, i32
  }
  func.func @transform_1(%arg0: i32) -> (i32, i32) {
    %c0_i32 = arith.constant 0 : i32
    %c0_i32_0 = arith.constant 0 : i32
    %c0_i32_1 = arith.constant 0 : i32
    return %c0_i32, %c0_i32_0 : i32, i32
  }
  func.func @transform_2(%arg0: i32) -> (i32, i32) {
    %c0_i32 = arith.constant 0 : i32
    %c0_i32_0 = arith.constant 0 : i32
    %c0_i32_1 = arith.constant 0 : i32
    return %c0_i32, %c0_i32_0 : i32, i32
  }
  func.func @transform_3(%arg0: i32) -> (i32, i32) {
    %c0_i32 = arith.constant 0 : i32
    %c0_i32_0 = arith.constant 0 : i32
    %c0_i32_1 = arith.constant 0 : i32
    return %c0_i32, %c0_i32_0 : i32, i32
  }
  func.func @transform_4(%arg0: i32) -> (i32, i32) {
    %c0_i32 = arith.constant 0 : i32
    %c0_i32_0 = arith.constant 0 : i32
    %c0_i32_1 = arith.constant 0 : i32
    return %c0_i32, %c0_i32_0 : i32, i32
  }
  func.func @transform_5(%arg0: i32) -> (i32, i32) {
    %c0_i32 = arith.constant 0 : i32
    %c0_i32_0 = arith.constant 0 : i32
    %c0_i32_1 = arith.constant 0 : i32
    return %c0_i32, %c0_i32_0 : i32, i32
  }
  func.func @transform_6(%arg0: i32) -> (i32, i32) {
    %c0_i32 = arith.constant 0 : i32
    %c0_i32_0 = arith.constant 0 : i32
    %c0_i32_1 = arith.constant 0 : i32
    return %c0_i32, %c0_i32_0 : i32, i32
  }
  func.func @transform_7(%arg0: i32) -> (i32, i32) {
    %c0_i32 = arith.constant 0 : i32
    %c0_i32_0 = arith.constant 0 : i32
    %c0_i32_1 = arith.constant 0 : i32
    return %c0_i32, %c0_i32_0 : i32, i32
  }
  func.func @transform_8(%arg0: i32) -> (i32, i32) {
    %c0_i32 = arith.constant 0 : i32
    %c0_i32_0 = arith.constant 0 : i32
    %c0_i32_1 = arith.constant 0 : i32
    return %c0_i32, %c0_i32_0 : i32, i32
  }
  func.func @transform_9(%arg0: i32) -> (i32, i32) {
    %c0_i32 = arith.constant 0 : i32
    %c0_i32_0 = arith.constant 0 : i32
    return %arg0, %c0_i32 : i32, i32
  }
}

</mosaic_0001>

<bundles_post_ra>
// kernel: tpu_custom_call.1
= control target key start
LH: loop header
LB: loop body
LE: loop exit
PB: predicated region body
PF: predicated region fallthrough
CT: control target
= control target key end

     0   :  { %14 = vsyncpa [#allocation3], 0  ;;  %s2462_s0 = inlined_call_operand.hbm [shape: f32[16,128], index: 0, kind: input, shape index: {}]   ;;  %s2463_s1 = inlined_call_operand.hbm [shape: f32[1,128], index: 1, kind: input, shape index: {}]   ;;  %s2464_s2 = inlined_call_operand.vmem [shape: f32[1,128], index: 2, kind: input, shape index: {}]   ;;  %s2465_s3 = inlined_call_operand.hbm [shape: bf16[128,384], index: 3, kind: input, shape index: {}]   ;;  %s2466_s4 = inlined_call_operand.hbm [shape: f32[1,384], index: 4, kind: input, shape index: {}]   ;;  %s2467_s5 = inlined_call_operand.hbm [shape: bf16[128,512], index: 5, kind: input, shape index: {}]   ;;  %s2468_s6 = inlined_call_operand.vmem [shape: f32[1,512], index: 6, kind: input, shape index: {}]   ;;  %s2469_s7 = inlined_call_operand.hbm [shape: bf16[512,128], index: 7, kind: input, shape index: {}]   ;;  %s2470_s8 = inlined_call_operand.vmem [shape: f32[1,128], index: 8, kind: input, shape index: {}]   ;;  %s2471_s9 = inlined_call_operand.hbm [shape: f32[16,128], index: 9, kind: output, shape index: {}]  }
   0x1   :  { %15 = vsyncpa [#allocation6], 0 }
   0x2   :  { %16 = vsyncpa [#allocation9], 0 }
   0x3   :  { %17 = vsyncpa [#allocation12], 0  ;;  %s37_s11 = sshll.u32 %s2463_s1, 4  ;;  %s38_s11 = int_to_ptr.hbm [resolvable:$true] %s37_s11 }
   0x4   :  { %18 = vsyncpa [#allocation4], 0  ;;  %s2202_s12 = smov [#allocation5]   ;;  %s63_s16 = sshll.u32 %s2466_s4, 4  ;;  %s64_s16 = int_to_ptr.hbm [resolvable:$true] %s63_s16 }
   0x5   :  { %s39_s13 = sshll.u32 %s2202_s12, 4  ;;  %s2203_s17 = smov [#allocation8]   ;;  %s40_s13 = int_to_ptr.vmem [resolvable:$true] %s39_s13 }
   0x6   :  { %42 = dma.hbm_to_vmem [thread:$0]  %s38_s11, 16, %s40_s13, [#allocation6]  }
   0x7   :  { %s65_s18 = sshll.u32 %s2203_s17, 4  ;;  %s23_s21 = sshll.u32 %s2462_s0, 4  ;;  %s66_s18 = int_to_ptr.vmem [resolvable:$true] %s65_s18  ;;  %s24_s21 = int_to_ptr.hbm [resolvable:$true] %s23_s21 }
   0x8   :  { %68 = dma.hbm_to_vmem [thread:$0]  %s64_s16, 48, %s66_s18, [#allocation9]  }
   0x9   :  { %s2204_s1 = smov [#allocation2]   ;;  %s49_s25 = sshll.u32 %s2465_s3, 4  ;;  %s50_s25 = int_to_ptr.hbm [resolvable:$true] %s49_s25 }
   0xa   :  { %s25_s22 = sshll.u32 %s2204_s1, 4  ;;  %s2205_s26 = smov 128   ;;  %s26_s22 = int_to_ptr.vmem [resolvable:$true] %s25_s22 }
   0xb   :  { %s2206_s4 = smov 8   ;;  %s2207_s27 = smov [#allocation7]  }
   0xc   :  { %31 = dma.hbm_to_vmem [thread:$0]  %s24_s21, 256, %s26_s22, [#allocation3], %s2205_s26, %s2205_s26, %s2206_s4  }
   0xd   :  { %s51_s28 = sshll.u32 %s2207_s27, 4  ;;  %s2208_s0 = smov 192   ;;  %s52_s28 = int_to_ptr.vmem [resolvable:$true] %s51_s28 }
   0xe   :  { %s2209_s29 = smov 12   ;;  %s73_s11 = sshll.u32 %s2467_s5, 4  ;;  %s74_s11 = int_to_ptr.hbm [resolvable:$true] %s73_s11 }
   0xf   :  { %57 = dma.hbm_to_vmem [thread:$0]  %s50_s25, 3072, %s52_s28, [#allocation6], %s2208_s0, %s2208_s0, %s2209_s29  }
  0x10   :  { %s2210_s12 = smov [#allocation10]   ;;  %s88_s15 = sshll.u32 %s2469_s7, 4  ;;  %s89_s15 = int_to_ptr.hbm [resolvable:$true] %s88_s15 }
  0x11   :  { %s75_s3 = sshll.u32 %s2210_s12, 4  ;;  %s2211_s16 = smov 256   ;;  %s76_s3 = int_to_ptr.vmem [resolvable:$true] %s75_s3 }
  0x12   :  { %s2212_s17 = smov 16   ;;  %s2213_s18 = smov [#allocation11]  }
  0x13   :  { %81 = dma.hbm_to_vmem [thread:$0]  %s74_s11, 4096, %s76_s3, [#allocation9], %s2211_s16, %s2211_s16, %s2212_s17  }
  0x14   :  { %s90_s19 = sshll.u32 %s2213_s18, 4  ;;  %s2214_s20 = smov 64   ;;  %s91_s19 = int_to_ptr.vmem [resolvable:$true] %s90_s19 }
  0x15   :  { %s2215_s21 = smov 4  }
  0x16   :  { %96 = dma.hbm_to_vmem [thread:$0]  %s89_s15, 4096, %s91_s19, [#allocation12], %s2214_s20, %s2214_s20, %s2215_s21  }
  0x17   :  { %2192 = dma.done.wait [#allocation3], 256  }
  0x18   :  { %2193 = vsyncadd [#allocation3], 4294967040 }
  0x19   :  { %2194 = dma.done.wait [#allocation6], 3088  }
  0x1a   :  { %2195 = vsyncadd [#allocation6], 4294964208 }
  0x1b   :  { %2196 = dma.done.wait [#allocation9], 4144  }
  0x1c   :  { %2197 = vsyncadd [#allocation9], 4294963152 }
  0x1d   :  { %2198 = dma.done.wait [#allocation12], 4096  }
  0x1e   :  { %2199 = vsyncadd [#allocation12], 4294963200  ;;  %v2304_v0 = vld [vmem:[#allocation2] sm:$0xff]  ;;  %v2307_v1 = vld [vmem:[#allocation2 + $0x8] sm:$0xff]  ;;  %v2216_v2 = vmov 128.0   ;;  %vm402_vm7 = vcmask 261120  }
  0x1f   :  { %128 = vadd.xlane.f32.xlu0 %v2304_v0  ;;  %2010 = vrcp.f32 %v2216_v2  ;;  %v1609_v17 = vld [vmem:[#allocation7 + $0xa8] sm:$0xf]  ;;  %v1913_v18 = vld [vmem:[#allocation7 + $0xb0] sm:$0xf0]  ;;  %v1912_v19 = vld [vmem:[#allocation7 + $0xac] sm:$0xf] }
  0x20   :  { %v1610_v20 = vor.u32 %v1913_v18, %v1609_v17  ;;  %v1611_v21 = vld [vmem:[#allocation7 + $0xb4] sm:$0xf0]  ;;  %v1617_v22 = vld [vmem:[#allocation7 + $0xb0] sm:$0xf]  ;;  %v1914_v23 = vld [vmem:[#allocation7 + $0xb8] sm:$0xf0] }
  0x21   :  { %v1614_v24 = vor.u32 %v1912_v19, %v1611_v21  ;;  %v1618_v25 = vor.u32 %v1914_v23, %v1617_v22  ;;  %v1597_v26 = vld [vmem:[#allocation7 + $0x90] sm:$0xf]  ;;  %v1910_v27 = vld [vmem:[#allocation7 + $0x98] sm:$0xf0]  ;;  %v1909_v28 = vld [vmem:[#allocation7 + $0x94] sm:$0xf] }
  0x22   :  { %354 = vmatpush.bf16.msra.mxu0 %v1610_v20  ;;  %v1598_v29 = vor.u32 %v1910_v27, %v1597_v26  ;;  %v1599_v30 = vld [vmem:[#allocation7 + $0x9c] sm:$0xf0]  ;;  %v1605_v31 = vld [vmem:[#allocation7 + $0x98] sm:$0xf]  ;;  %v1911_v32 = vld [vmem:[#allocation7 + $0xa0] sm:$0xf0] }
  0x23   :  { %368 = vmatpush.bf16.msra.mxu1 %v1614_v24  ;;  %382 = vmatpush.bf16.msra.mxu2 %v1618_v25  ;;  %v1602_v33 = vor.u32 %v1909_v28, %v1599_v30  ;;  %v1606_v34 = vor.u32 %v1911_v32, %v1605_v31  ;;  %v1585_v35 = vld [vmem:[#allocation7 + $0x78] sm:$0xf]  ;;  %v1907_v36 = vld [vmem:[#allocation7 + $0x80] sm:$0xf0]  ;;  %v1906_v37 = vld [vmem:[#allocation7 + $0x7c] sm:$0xf] }
  0x24   :  { %v1586_v38 = vor.u32 %v1907_v36, %v1585_v35  ;;  %v1587_v39 = vld [vmem:[#allocation7 + $0x84] sm:$0xf0]  ;;  %v1593_v40 = vld [vmem:[#allocation7 + $0x80] sm:$0xf]  ;;  %v1908_v41 = vld [vmem:[#allocation7 + $0x88] sm:$0xf0] }
  0x25   :  { %v2011_v3 = vpop.eup %2010  ;;  %v1590_v42 = vor.u32 %v1906_v37, %v1587_v39  ;;  %v1594_v43 = vor.u32 %v1908_v41, %v1593_v40  ;;  %v1573_v44 = vld [vmem:[#allocation7 + $0x60] sm:$0xf]  ;;  %v1904_v45 = vld [vmem:[#allocation7 + $0x68] sm:$0xf0]  ;;  %v1903_v46 = vld [vmem:[#allocation7 + $0x64] sm:$0xf] }
  0x26   :  { %v133_v4 = vmul.f32 128.0, %v2011_v3  ;;  %vm137_vm0 = vweird.f32 %v2011_v3  ;;  %355 = vmatpush.bf16.msra.mxu0 %v1598_v29  ;;  %v1574_v47 = vor.u32 %v1904_v45, %v1573_v44  ;;  %v1575_v48 = vld [vmem:[#allocation7 + $0x6c] sm:$0xf0]  ;;  %v1581_v49 = vld [vmem:[#allocation7 + $0x68] sm:$0xf]  ;;  %s2218_s1 = smov 96  }
  0x27   :  { %130 = vadd.xlane.f32.xlu0 %v2307_v1  ;;  %369 = vmatpush.bf16.msra.mxu1 %v1602_v33  ;;  %v1905_v50 = vld [vmem:[#allocation7 + $0x70] sm:$0xf0]  ;;  %v1578_v51 = vor.u32 %v1903_v46, %v1575_v48  ;;  %v1561_v53 = vld [vmem:[#allocation7 + $0x48] sm:$0xf]  ;;  %v1900_v55 = vld [vmem:[#allocation7 + $0x4c] sm:$0xf] }
  0x28   :  { %v134_v5 = vsub.f32 1.0, %v133_v4  ;;  %383 = vmatpush.bf16.msra.mxu2 %v1606_v34  ;;  %v1582_v52 = vor.u32 %v1905_v50, %v1581_v49  ;;  %v1901_v54 = vld [vmem:[#allocation7 + $0x50] sm:$0xf0]  ;;  %v1563_v57 = vld [vmem:[#allocation7 + $0x54] sm:$0xf0]  ;;  %vm656_vm8 = vcmask 1043456  }
  0x29   :  { %v1562_v56 = vor.u32 %v1901_v54, %v1561_v53  ;;  %v1569_v58 = vld [vmem:[#allocation7 + $0x50] sm:$0xf]  ;;  %v1902_v59 = vld [vmem:[#allocation7 + $0x58] sm:$0xf0]  ;;  %v1566_v60 = vor.u32 %v1900_v55, %v1563_v57  ;;  %v1897_v2 = vld [vmem:[#allocation7 + $0x34] sm:$0xf] }
  0x2a   :  { %v135_v6 = vmul.f32 %v2011_v3, %v134_v5  ;;  %356 = vmatpush.bf16.msra.mxu0 %v1586_v38  ;;  %v1570_v61 = vor.u32 %v1902_v59, %v1569_v58  ;;  %v1549_v62 = vld [vmem:[#allocation7 + $0x30] sm:$0xf]  ;;  %v1898_v63 = vld [vmem:[#allocation7 + $0x38] sm:$0xf0]  ;;  %v1551_v4 = vld [vmem:[#allocation7 + $0x3c] sm:$0xf0] }
  0x2b   :  { %370 = vmatpush.bf16.msra.mxu1 %v1590_v42  ;;  %v1557_v5 = vld [vmem:[#allocation7 + $0x38] sm:$0xf]  ;;  %v1545_v17 = vld [vmem:[#allocation7 + $0x20] sm:$0xf]  ;;  %v1896_v18 = vld [vmem:[#allocation7 + $0x28] sm:$0xf0] }
  0x2c   :  { %v136_v7 = vadd.f32 %v2011_v3, %v135_v6  ;;  %384 = vmatpush.bf16.msra.mxu2 %v1594_v43  ;;  %v1899_v6 = vld [vmem:[#allocation7 + $0x40] sm:$0xf0]  ;;  %v1546_v20 = vor.u32 %v1896_v18, %v1545_v17  ;;  %v1525_v21 = vld [vmem:[#allocation7] sm:$0xf]  ;;  %v1892_v22 = vld [vmem:[#allocation7 + $0x8] sm:$0xf0] }
  0x2d   :  { %v1891_v23 = vld [vmem:[#allocation7 + $0x4] sm:$0xf]  ;;  %v1526_v25 = vor.u32 %v1892_v22, %v1525_v21  ;;  %v1527_v26 = vld [vmem:[#allocation7 + $0xc] sm:$0xf0]  ;;  %v1533_v27 = vld [vmem:[#allocation7 + $0x8] sm:$0xf] }
  0x2e   :  { %v2310_v8 = vsel %vm137_vm0, %v2011_v3, %v136_v7  ;;  %357 = vmatpush.bf16.msra.mxu0 %v1574_v47  ;;  %v1550_v3 = vor.u32 %v1898_v63, %v1549_v62  ;;  %v1554_v7 = vor.u32 %v1897_v2, %v1551_v4  ;;  %v1893_v28 = vld [vmem:[#allocation7 + $0x10] sm:$0xf0]  ;;  %v1530_v30 = vor.u32 %v1891_v23, %v1527_v26  ;;  %v2327_v49 = vld [vmem:[#allocation5] ss:$0 sm:$0xff]  ;;  %v2334_v54 = vld [vmem:[%s2464_s2] ss:$0 sm:$0xff] }
  0x2f   :  { %371 = vmatpush.bf16.msra.mxu1 %v1578_v51  ;;  %v1534_v31 = vor.u32 %v1893_v28, %v1533_v27  ;;  %v218_v58 = vld [vmem:[#allocation8] sm:$0x7]  ;;  %s2217_s2 = smov 32   ;;  %s2219_s22 = smov 24   ;;  %vm619_vm9 = vcmask 64512   ;;  %vm621_vm10 = vcmask 130048  }
  0x30   :  { %385 = vmatpush.bf16.msra.mxu2 %v1582_v52  ;;  %v221_v59 = vperm.slane %v218_v58, 1  ;;  %s2220_s23 = smov 40   ;;  %s2221_s24 = smov 56   ;;  %vm623_vm11 = vcmask 195584   ;;  %vm626_vm12 = vcmask 326656   ;;  %vm628_vm13 = vcmask 392192  }
  0x31   :  { %s2222_s25 = smov 48   ;;  %vm630_vm14 = vcmask 457728   ;;  %vm632_vm15 = vcmask 523264   ;;  %s2223_s27 = smov 112   ;;  %vm762_vm0 = vcmask 785408  }
  0x32   :  { %358 = vmatpush.bf16.msra.mxu0 %v1562_v56  ;;  %s2224_s28 = smov 120   ;;  %s2225_s0 = smov 104  }
  0x33   :  { %372 = vmatpush.bf16.msra.mxu1 %v1566_v60  ;;  %s2226_s29 = smov 80   ;;  %s2227_s30 = smov 88  }
  0x34   :  { %386 = vmatpush.bf16.msra.mxu2 %v1570_v61  ;;  %s2228_s10 = smov 72   ;;  %s2229_s13 = smov [#allocation13]  }
  0x35   :  { %s1505_s14 = sshll.u32 %s2229_s13, 4  ;;  %s1507_s16 = sshll.u32 %s2471_s9, 4  ;;  %s1506_s14 = int_to_ptr.vmem [resolvable:$true] %s1505_s14  ;;  %s1508_s16 = int_to_ptr.hbm [resolvable:$true] %s1507_s16 }
  0x36   :  { %359 = vmatpush.bf16.msra.mxu0 %v1550_v3  ;;  %v222_v3 = vperm.slane %v218_v58, 2 }
  0x37   :  { %373 = vmatpush.bf16.msra.mxu1 %v1554_v7 }
  0x92   :  { %v129_v9 = vpop.xlane.xlu0 %128 }
  0x93   :  { %v139_v10 = vmul.f32 %v2310_v8, %v129_v9  ;;  %v1558_v9 = vor.u32 %v1899_v6, %v1557_v5 }
  0x95   :  { %v2314_v11 = vsub.f32 %v2304_v0, %v139_v10  ;;  %387 = vmatpush.bf16.msra.mxu2 %v1558_v9  ;;  %v1537_v10 = vld [vmem:[#allocation7 + $0x18] sm:$0xf] }
  0x97   :  { %v143_v12 = vmul.f32 %v2314_v11, %v2314_v11 }
  0x99   :  { %145 = vadd.xlane.f32.xlu1 %v143_v12  ;;  %v1895_v12 = vld [vmem:[#allocation7 + $0x20] sm:$0xf0]  ;;  %388 = vmatpush.bf16.msra.mxu2 %v1546_v20 }
  0x9a   :  { %v131_v13 = vpop.xlane.xlu0 %130 }
  0x9b   :  { %v140_v14 = vmul.f32 %v2310_v8, %v131_v13  ;;  %v1894_v13 = vld [vmem:[#allocation7 + $0x1c] sm:$0xf] }
  0x9d   :  { %v2320_v15 = vsub.f32 %v2307_v1, %v140_v14  ;;  %v1538_v14 = vor.u32 %v1895_v12, %v1537_v10  ;;  %389 = vmatpush.bf16.msra.mxu2 %v1534_v31 }
  0x9f   :  { %v144_v16 = vmul.f32 %v2320_v15, %v2320_v15  ;;  %360 = vmatpush.bf16.msra.mxu0 %v1538_v14 }
  0xa1   :  { %147 = vadd.xlane.f32.xlu1 %v144_v16  ;;  %v1539_v16 = vld [vmem:[#allocation7 + $0x24] sm:$0xf0] }
  0xa2   :  { %v1542_v19 = vor.u32 %v1894_v13, %v1539_v16 }
  0xa3   :  { %361 = vmatpush.bf16.msra.mxu0 %v1526_v25 }
  0xa4   :  { %374 = vmatpush.bf16.msra.mxu1 %v1542_v19 }
  0xa8   :  { %375 = vmatpush.bf16.msra.mxu1 %v1530_v30 }
 0x10c   :  { %v146_v24 = vpop.xlane.xlu1 %145 }
 0x10d   :  { %v149_v29 = vmul.f32 %v146_v24, %v2310_v8 }
 0x10f   :  { %v151_v32 = vadd.f32 1e-05, %v149_v29 }
 0x111   :  { %2012 = vrsqrt.f32 %v151_v32  ;;  %vm159_vm2 = vweird.f32 %v151_v32 }
 0x114   :  { %v148_v33 = vpop.xlane.xlu1 %147 }
 0x115   :  { %v150_v34 = vmul.f32 %v148_v33, %v2310_v8 }
 0x117   :  { %v2013_v35 = vpop.eup %2012  ;;  %v152_v36 = vadd.f32 1e-05, %v150_v34 }
 0x118   :  { %v154_v37 = vmul.f32 %v2013_v35, %v151_v32  ;;  %vm160_vm1 = vweird.f32 %v2013_v35 }
 0x119   :  { %2014 = vrsqrt.f32 %v152_v36  ;;  %vm161_vm3 = vmor %vm159_vm2, %vm160_vm1  ;;  %vm169_vm5 = vweird.f32 %v152_v36 }
 0x11a   :  { %v155_v38 = vmul.f32 %v2013_v35, %v154_v37 }
 0x11c   :  { %v156_v39 = vmul.f32 0.5, %v155_v38 }
 0x11e   :  { %v157_v40 = vsub.f32 1.5, %v156_v39 }
 0x11f   :  { %v2015_v41 = vpop.eup %2014 }
 0x120   :  { %v158_v42 = vmul.f32 %v2013_v35, %v157_v40  ;;  %v164_v43 = vmul.f32 %v2015_v41, %v152_v36  ;;  %vm170_vm4 = vweird.f32 %v2015_v41 }
 0x121   :  { %vm171_vm6 = vmor %vm169_vm5, %vm170_vm4 }
 0x122   :  { %v165_v44 = vmul.f32 %v2015_v41, %v164_v43  ;;  %v162_v45 = vsel %vm161_vm3, %v2013_v35, %v158_v42 }
 0x123   :  { %v173_v48 = vmul.f32 %v162_v45, %v2314_v11 }
 0x124   :  { %v166_v46 = vmul.f32 0.5, %v165_v44 }
 0x125   :  { %v178_v53 = vmul.f32 %v2327_v49, %v173_v48 }
 0x126   :  { %v167_v47 = vsub.f32 1.5, %v166_v46 }
 0x127   :  { %v183_v56 = vadd.f32 %v2334_v54, %v178_v53 }
 0x128   :  { %v168_v50 = vmul.f32 %v2015_v41, %v167_v47 }
 0x12a   :  { %v172_v51 = vsel %vm171_vm6, %v2015_v41, %v168_v50 }
 0x12b   :  { %v174_v52 = vmul.f32 %v172_v51, %v2320_v15  ;;  %v220_v15 = vperm.slane %v218_v58, 0 }
 0x12d   :  { %v179_v55 = vmul.f32 %v2327_v49, %v174_v52 }
 0x12f   :  { %v184_v11 = vadd.f32 %v2334_v54, %v179_v55 }
 0x131   :  { %v185_v57 = vpack.c.bf16 %v184_v11, %v183_v56 }
 0x133   :  { %362 = vmatmul.bf16.vlgmr.msra.gmra.mxu0 %v185_v57  ;;  %376 = vmatmul.bf16.vlgmr.msra.gmra.mxu1 %v185_v57 }
 0x134   :  { %390 = vmatmul.bf16.vlgmr.msra.gmra.mxu2 %v185_v57 }
 0x1b0   :  { %v363_v60 = vpop.f32.mrf.mxu0  ;;  %v377_v61 = vpop.f32.mrf.mxu1 }
 0x1b1   :  { %v378_v62 = vadd.f32 %v377_v61, %v221_v59  ;;  %v364_v2 = vadd.f32 %v363_v60, %v220_v15 }
 0x1b3   :  { %v398_v63 = vpack.c.bf16 %v378_v62, %v378_v62  ;;  %v396_v9 = vpack.c.bf16 %v364_v2, %v364_v2 }
 0x1b5   :  { %v428_v4 = vunpack.c.l.b16 %v398_v63  ;;  %v407_v5 = vsel %vm402_vm7, %v398_v63, 0  ;;  %v423_v19 = vunpack.c.l.b16 %v396_v9 }
 0x1b6   :  { %416 = vmatpush.bf16.xpose.msra.mxu3 %v407_v5 }
 0x1b7   :  { %v429_v6 = vpack.c.b16 %v428_v4, %v428_v4  ;;  %v391_v7 = vpop.f32.mrf.mxu2  ;;  %v424_v26 = vpack.c.b16 %v423_v19, %v423_v19 }
 0x1b8   :  { %v392_v10 = vadd.f32 %v391_v7, %v222_v3  ;;  %v365_v12 = vpop.f32.mrf.mxu0  ;;  %v379_v13 = vpop.f32.mrf.mxu1 }
 0x1b9   :  { %v380_v14 = vadd.f32 %v379_v13, %v221_v59  ;;  %476 = vrot.lane.b32.xlu1 %v429_v6, %s2217_s2  ;;  %453 = vrot.lane.b32.xlu0 %v429_v6, %s2214_s20  ;;  %v366_v17 = vadd.f32 %v365_v12, %v220_v15 }
 0x1ba   :  { %v2342_v16 = vpack.c.bf16 %v392_v10, %v392_v10  ;;  %430 = vrot.lane.b32.xlu2 %v429_v6, %s2218_s1 }
 0x1bb   :  { %v399_v18 = vpack.c.bf16 %v380_v14, %v380_v14  ;;  %v397_v23 = vpack.c.bf16 %v366_v17, %v366_v17 }
 0x1bc   :  { %v658_v22 = vsel %vm656_vm8, %v2342_v16, 0  ;;  %v679_v62 = vunpack.c.l.b16 %v2342_v16 }
 0x1bd   :  { %v522_v20 = vunpack.c.l.b16 %v399_v18  ;;  %1619 = vmatmul.msk.bf16.vlgmr.msra.gmra.mxu3 %vm402_vm7, %v396_v9  ;;  %v501_v21 = vsel %vm402_vm7, %v399_v18, 0  ;;  %v517_v29 = vunpack.c.l.b16 %v397_v23 }
 0x1be   :  { %510 = vmatpush.bf16.xpose.msrb.mxu1 %v501_v21  ;;  %v680_v63 = vpack.c.b16 %v679_v62, %v679_v62 }
 0x1bf   :  { %v523_v24 = vpack.c.b16 %v522_v20, %v522_v20  ;;  %v393_v25 = vpop.f32.mrf.mxu2  ;;  %v518_v31 = vpack.c.b16 %v517_v29, %v517_v29 }
 0x1c0   :  { %v394_v27 = vadd.f32 %v393_v25, %v222_v3 }
 0x1c1   :  { %570 = vrot.lane.b32.xlu1 %v523_v24, %s2217_s2  ;;  %547 = vrot.lane.b32.xlu0 %v523_v24, %s2214_s20 }
 0x1c2   :  { %v2351_v28 = vpack.c.bf16 %v394_v27, %v394_v27  ;;  %425 = vrot.lane.b32.xlu2 %v424_v26, %s2218_s1 }
 0x1c4   :  { %v770_v30 = vsel %vm656_vm8, %v2351_v28, 0  ;;  %v788_v6 = vunpack.c.l.b16 %v2351_v28 }
 0x1c5   :  { %1623 = vmatmul.msk.bf16.vlgmr.msrb.gmra.mxu1 %vm402_vm7, %v397_v23 }
 0x1c6   :  { %667 = vmatpush.bf16.msra.mxu1 %v658_v22  ;;  %v2383_v7 = vpack.c.b16 %v788_v6, %v788_v6 }
 0x1c9   :  { %545 = vrot.lane.b32.xlu0 %v518_v31, %s2214_s20 }
 0x1ca   :  { %779 = vmatpush.bf16.msrb.mxu1 %v770_v30  ;;  %451 = vrot.lane.b32.xlu2 %v424_v26, %s2214_s20 }
 0x1d2   :  { %474 = vrot.lane.b32.xlu2 %v424_v26, %s2217_s2 }
 0x1da   :  { %524 = vrot.lane.b32.xlu2 %v523_v24, %s2218_s1 }
 0x1e2   :  { %519 = vrot.lane.b32.xlu2 %v518_v31, %s2218_s1 }
 0x1ea   :  { %568 = vrot.lane.b32.xlu2 %v518_v31, %s2217_s2 }
 0x214   :  { %v431_v32 = vpop.permute.xlu2 %430 }
 0x215   :  { %v436_v33 = vsel %vm402_vm7, %v431_v32, 0 }
 0x216   :  { %445 = vmatpush.bf16.xpose.msrb.mxu3 %v436_v33 }
 0x21c   :  { %v426_v34 = vpop.permute.xlu2 %425 }
 0x21d   :  { %1620 = vmatmul.msk.bf16.vlgmr.msrb.gmra.mxu3 %vm402_vm7, %v426_v34 }
 0x224   :  { %v452_v35 = vpop.permute.xlu2 %451 }
 0x22b   :  { %v477_v36 = vpop.permute.xlu1 %476  ;;  %v454_v37 = vpop.permute.xlu0 %453 }
 0x22c   :  { %v459_v38 = vsel %vm402_vm7, %v454_v37, 0  ;;  %v475_v39 = vpop.permute.xlu2 %474  ;;  %v482_v40 = vsel %vm402_vm7, %v477_v36, 0 }
 0x22d   :  { %468 = vmatpush.bf16.xpose.msra.mxu3 %v459_v38  ;;  %491 = vmatpush.bf16.xpose.msrb.mxu0 %v482_v40 }
 0x233   :  { %v571_v41 = vpop.permute.xlu1 %570  ;;  %v548_v42 = vpop.permute.xlu0 %547 }
 0x234   :  { %v576_v43 = vsel %vm402_vm7, %v571_v41, 0  ;;  %v553_v44 = vsel %vm402_vm7, %v548_v42, 0  ;;  %v525_v45 = vpop.permute.xlu2 %524  ;;  %1621 = vmatmul.msk.bf16.vlgmr.msra.gmra.mxu3 %vm402_vm7, %v452_v35  ;;  %1622 = vmatmul.msk.bf16.vlgmr.msrb.gmra.mxu0 %vm402_vm7, %v475_v39 }
 0x235   :  { %v530_v46 = vsel %vm402_vm7, %v525_v45, 0  ;;  %562 = vmatpush.bf16.xpose.msrb.mxu3 %v553_v44  ;;  %585 = vmatpush.bf16.xpose.msra.mxu0 %v576_v43 }
 0x236   :  { %539 = vmatpush.bf16.xpose.msrb.mxu2 %v530_v46 }
 0x23b   :  { %v546_v51 = vpop.permute.xlu0 %545 }
 0x23c   :  { %v520_v47 = vpop.permute.xlu2 %519 }
 0x23d   :  { %1624 = vmatmul.msk.bf16.vlgmr.msrb.gmra.mxu2 %vm402_vm7, %v520_v47 }
 0x240   :  { %v418_v48 = vpop.f32.mrf.mxu3 }
 0x242   :  { %v512_v50 = vpop.f32.mrf.mxu1 }
 0x243   :  { %604 = vrot.lane.b32.xlu1 %v512_v50, %s2217_s2 }
 0x244   :  { %v569_v52 = vpop.permute.xlu2 %568  ;;  %1625 = vmatmul.msk.bf16.vlgmr.msrb.gmra.mxu3 %vm402_vm7, %v546_v51 }
 0x245   :  { %1626 = vmatmul.msk.bf16.vlgmr.msra.gmra.mxu0 %vm402_vm7, %v569_v52 }
 0x248   :  { %v420_v53 = vpop.f32.mrf.mxu3 }
 0x24a   :  { %v514_v55 = vpop.f32.mrf.mxu1 }
 0x2a0   :  { %v447_v56 = vpop.f32.mrf.mxu3 }
 0x2a1   :  { %592 = vrot.lane.b32.xlu1 %v447_v56, %s2206_s4 }
 0x2a8   :  { %v449_v11 = vpop.f32.mrf.mxu3 }
 0x2b1   :  { %v493_v57 = vpop.f32.mrf.mxu0 }
 0x2b2   :  { %600 = vrot.lane.b32.xlu2 %v493_v57, %s2219_s22 }
 0x2b5   :  { %v605_v10 = vpop.permute.xlu1 %604 }
 0x2b7   :  { %v470_v58 = vpop.f32.mrf.mxu3 }
 0x2b8   :  { %596 = vrot.lane.b32.xlu0 %v470_v58, %s2212_s17 }
 0x2b9   :  { %v495_v59 = vpop.f32.mrf.mxu0 }
 0x2bf   :  { %v472_v15 = vpop.f32.mrf.mxu3 }
 0x2c0   :  { %v541_v60 = vpop.f32.mrf.mxu2 }
 0x2c1   :  { %608 = vrot.lane.b32.xlu0 %v541_v60, %s2220_s23 }
 0x2c2   :  { %v587_v61 = vpop.f32.mrf.mxu0 }
 0x2c3   :  { %616 = vrot.lane.b32.xlu1 %v587_v61, %s2221_s24 }
 0x2c7   :  { %v564_v2 = vpop.f32.mrf.mxu3 }
 0x2c8   :  { %v543_v3 = vpop.f32.mrf.mxu2  ;;  %612 = vrot.lane.b32.xlu2 %v564_v2, %s2222_s25 }
 0x2c9   :  { %681 = vrot.lane.b32.xlu0 %v680_v63, %s2218_s1 }
 0x2ca   :  { %v589_v4 = vpop.f32.mrf.mxu0 }
 0x2cf   :  { %v566_v5 = vpop.f32.mrf.mxu3 }
 0x2d0   :  { %704 = vrot.lane.b32.xlu2 %v680_v63, %s2214_s20 }
 0x2d8   :  { %727 = vrot.lane.b32.xlu2 %v680_v63, %s2217_s2 }
 0x2e0   :  { %813 = vrot.lane.b32.xlu2 %v2383_v7, %s2214_s20 }
 0x2e8   :  { %836 = vrot.lane.b32.xlu2 %v2383_v7, %s2217_s2 }
 0x30c   :  { %v601_v9 = vpop.permute.xlu2 %600 }
 0x313   :  { %v593_v13 = vpop.permute.xlu1 %592 }
 0x314   :  { %v620_v18 = vsel %vm619_vm9, %v418_v48, %v593_v13 }
 0x322   :  { %v613_v12 = vpop.permute.xlu2 %612 }
 0x32a   :  { %v597_v14 = vpop.permute.xlu0 %596  ;;  %v705_v16 = vpop.permute.xlu2 %704 }
 0x32b   :  { %v710_v17 = vsel %vm656_vm8, %v705_v16, 0  ;;  %v622_v19 = vsel %vm621_vm10, %v620_v18, %v597_v14 }
 0x32c   :  { %719 = vmatpush.bf16.msra.mxu3 %v710_v17  ;;  %v624_v20 = vsel %vm623_vm11, %v622_v19, %v601_v9 }
 0x32d   :  { %v625_v22 = vsel %vm402_vm7, %v624_v20, %v605_v10 }
 0x332   :  { %v728_v21 = vpop.permute.xlu2 %727 }
 0x333   :  { %v609_v23 = vpop.permute.xlu0 %608  ;;  %v733_v24 = vsel %vm656_vm8, %v728_v21, 0 }
 0x334   :  { %v627_v25 = vsel %vm626_vm12, %v625_v22, %v609_v23  ;;  %742 = vmatpush.bf16.msrb.mxu0 %v733_v24 }
 0x335   :  { %v617_v26 = vpop.permute.xlu1 %616  ;;  %v629_v27 = vsel %vm628_vm13, %v627_v25, %v613_v12 }
 0x336   :  { %v631_v28 = vsel %vm630_vm14, %v629_v27, %v617_v26 }
 0x337   :  { %v633_v29 = vsel %vm632_vm15, %v631_v28, -inf }
 0x338   :  { %v634_v30 = vrot.slane %v633_v29, 4 }
 0x33a   :  { %v635_v31 = vmax.f32 %v633_v29, %v634_v30  ;;  %v814_v32 = vpop.permute.xlu2 %813 }
 0x33b   :  { %v682_v33 = vpop.permute.xlu0 %681  ;;  %v819_v34 = vsel %vm656_vm8, %v814_v32, 0 }
 0x33c   :  { %v636_v35 = vrot.slane %v635_v31, 2  ;;  %v687_v36 = vsel %vm656_vm8, %v682_v33, 0  ;;  %828 = vmatpush.bf16.msrb.mxu3 %v819_v34 }
 0x33d   :  { %696 = vmatpush.bf16.msra.mxu2 %v687_v36 }
 0x33e   :  { %v637_v37 = vmax.f32 %v635_v31, %v636_v35 }
 0x340   :  { %v638_v38 = vrot.slane %v637_v37, 1 }
 0x342   :  { %v639_v39 = vmax.f32 %v637_v37, %v638_v38  ;;  %v837_v40 = vpop.permute.xlu2 %836 }
 0x343   :  { %v842_v41 = vsel %vm656_vm8, %v837_v40, 0 }
 0x344   :  { %v640_v42 = vsub.f32 %v631_v28, %v639_v39  ;;  %851 = vmatpush.bf16.msra.mxu0 %v842_v41 }
 0x346   :  { %v641_v43 = vmul.f32 1.442695, %v640_v42 }
 0x348   :  { %2016 = vpow2.f32 %v641_v43  ;;  %v1749_v43 = vld [vmem:[#allocation10 + $0xe0] sm:$0xf] }
 0x34e   :  { %v2017_v44 = vpop.eup %2016 }
 0x34f   :  { %v643_v45 = vsel %vm632_vm15, %v2017_v44, 0.0 }
 0x350   :  { %v644_v46 = vrot.slane %v643_v45, 4 }
 0x352   :  { %v645_v47 = vadd.f32 %v644_v46, %v643_v45  ;;  %v1943_v45 = vld [vmem:[#allocation10 + $0xe4] sm:$0xf] }
 0x354   :  { %v646_v48 = vrot.slane %v645_v47, 2 }
 0x356   :  { %v647_v50 = vadd.f32 %v646_v48, %v645_v47  ;;  %v1751_v47 = vld [vmem:[#allocation10 + $0xf0] sm:$0xf0]  ;;  %v1757_v48 = vld [vmem:[#allocation10 + $0xe8] sm:$0xf] }
 0x358   :  { %v648_v51 = vrot.slane %v647_v50, 1 }
 0x35a   :  { %v649_v52 = vadd.f32 %v648_v51, %v647_v50  ;;  %v1946_v50 = vld [vmem:[#allocation10 + $0xf4] sm:$0xf0]  ;;  %v1754_v51 = vor.u32 %v1943_v45, %v1751_v47  ;;  %v1925_v47 = vld [vmem:[#allocation10 + $0x4c] sm:$0xf0] }
 0x35c   :  { %2018 = vrcp.f32 %v649_v52  ;;  %v1758_v52 = vor.u32 %v1946_v50, %v1757_v48  ;;  %v1923_v48 = vld [vmem:[#allocation10 + $0x44] sm:$0xf] }
 0x362   :  { %v2019_v53 = vpop.eup %2018 }
 0x363   :  { %v651_v55 = vmul.f32 %v2019_v53, %v2017_v44  ;;  %v1945_v44 = vld [vmem:[#allocation10 + $0xec] sm:$0xf0]  ;;  %v1944_v53 = vld [vmem:[#allocation10 + $0xec] sm:$0xf] }
 0x364   :  { %v1750_v46 = vor.u32 %v1945_v44, %v1749_v43  ;;  %v1928_v43 = vld [vmem:[#allocation10 + $0x6c] sm:$0xf]  ;;  %v1695_v44 = vld [vmem:[#allocation10 + $0x78] sm:$0xf0] }
 0x365   :  { %v652_v56 = vpack.c.bf16 %v651_v55, %v651_v55  ;;  %v1759_v55 = vld [vmem:[#allocation10 + $0xf8] sm:$0xf0]  ;;  %v1698_v45 = vor.u32 %v1928_v43, %v1695_v44  ;;  %v1968_v43 = vld [vmem:[#allocation11 + $0xa8] sm:$0xff] }
 0x367   :  { %v674_v11 = vunpack.c.l.b16 %v652_v56  ;;  %1627 = vmatmul.msk.bf16.vlgmr.msra.gmra.mxu1 %vm619_vm9, %v652_v56  ;;  %v1762_v56 = vor.u32 %v1944_v53, %v1759_v55  ;;  %v1926_v53 = vld [vmem:[#allocation10 + $0x54] sm:$0xf0] }
 0x368   :  { %1121 = vmatpush.bf16.msra.mxu1 %v1750_v46  ;;  %v1669_v46 = vld [vmem:[#allocation10 + $0x40] sm:$0xf] }
 0x369   :  { %v675_v57 = vpack.c.b16 %v674_v11, %v674_v11  ;;  %v1733_v11 = vld [vmem:[#allocation10 + $0xc0] sm:$0xf]  ;;  %v1670_v50 = vor.u32 %v1925_v47, %v1669_v46 }
 0x36a   :  { %v1951_v46 = vld [vmem:[#allocation11 + $0x20] sm:$0xff] }
 0x36b   :  { %702 = vrot.lane.b32.xlu0 %v675_v57, %s2223_s27  ;;  %676 = vrot.lane.b32.xlu1 %v675_v57, %s2224_s28  ;;  %v1975_v47 = vld [vmem:[#allocation11 + $0xe0] sm:$0xff] }
 0x373   :  { %790 = vrot.lane.b32.xlu0 %v2383_v7, %s2218_s1  ;;  %725 = vrot.lane.b32.xlu1 %v675_v57, %s2225_s0 }
 0x37b   :  { %811 = vrot.lane.b32.xlu0 %v675_v57, %s2226_s29  ;;  %785 = vrot.lane.b32.xlu1 %v675_v57, %s2227_s30 }
 0x383   :  { %764 = vrot.lane.b32.xlu0 %v675_v57, %s2218_s1  ;;  %834 = vrot.lane.b32.xlu1 %v675_v57, %s2228_s10  ;;  %v1941_v57 = vld [vmem:[#allocation10 + $0xcc] sm:$0xf0] }
 0x3dd   :  { %v703_v58 = vpop.permute.xlu0 %702  ;;  %v677_v59 = vpop.permute.xlu1 %676 }
 0x3de   :  { %1628 = vmatmul.msk.bf16.vlgmr.msra.gmra.mxu2 %vm619_vm9, %v677_v59  ;;  %1629 = vmatmul.msk.bf16.vlgmr.msra.gmra.mxu3 %vm619_vm9, %v703_v58  ;;  %v1939_v58 = vld [vmem:[#allocation10 + $0xc4] sm:$0xf]  ;;  %v1734_v59 = vor.u32 %v1941_v57, %v1733_v11  ;;  %v1924_v11 = vld [vmem:[#allocation10 + $0x4c] sm:$0xf]  ;;  %v1679_v57 = vld [vmem:[#allocation10 + $0x58] sm:$0xf0] }
 0x3df   :  { %1149 = vmatpush.bf16.msra.mxu3 %v1758_v52  ;;  %v1677_v52 = vld [vmem:[#allocation10 + $0x48] sm:$0xf] }
 0x3e0   :  { %1122 = vmatpush.bf16.msra.mxu1 %v1734_v59  ;;  %v1653_v59 = vld [vmem:[#allocation10 + $0x20] sm:$0xf] }
 0x3e4   :  { %v669_v15 = vpop.f32.mrf.mxu1 }
 0x3e5   :  { %v791_v60 = vpop.permute.xlu0 %790  ;;  %v726_v61 = vpop.permute.xlu1 %725 }
 0x3e6   :  { %v796_v62 = vsel %vm656_vm8, %v791_v60, 0  ;;  %1630 = vmatmul.msk.bf16.vlgmr.msrb.gmra.mxu0 %vm619_vm9, %v726_v61  ;;  %v1741_v60 = vld [vmem:[#allocation10 + $0xc8] sm:$0xf]  ;;  %v1942_v61 = vld [vmem:[#allocation10 + $0xd4] sm:$0xf0] }
 0x3e7   :  { %805 = vmatpush.bf16.msrb.mxu2 %v796_v62  ;;  %1163 = vmatpush.bf16.msrb.mxu0 %v1762_v56  ;;  %v1678_v56 = vor.u32 %v1926_v53, %v1677_v52 }
 0x3eb   :  { %1135 = vmatpush.bf16.msra.mxu2 %v1754_v51  ;;  %v1671_v51 = vld [vmem:[#allocation10 + $0x50] sm:$0xf0] }
 0x3ec   :  { %v671_v63 = vpop.f32.mrf.mxu1  ;;  %v1674_v55 = vor.u32 %v1923_v48, %v1671_v51 }
 0x3ed   :  { %v812_v2 = vpop.permute.xlu0 %811  ;;  %v786_v3 = vpop.permute.xlu1 %785  ;;  %v1742_v63 = vor.u32 %v1942_v61, %v1741_v60  ;;  %v1919_v60 = vld [vmem:[#allocation10 + $0x24] sm:$0xf] }
 0x3ee   :  { %1632 = vmatmul.msk.bf16.vlgmr.msrb.gmra.mxu2 %vm619_vm9, %v786_v3  ;;  %1633 = vmatmul.msk.bf16.vlgmr.msrb.gmra.mxu3 %vm619_vm9, %v812_v2  ;;  %v1940_v2 = vld [vmem:[#allocation10 + $0xcc] sm:$0xf]  ;;  %v1743_v3 = vld [vmem:[#allocation10 + $0xd8] sm:$0xf0] }
 0x3ef   :  { %1150 = vmatpush.bf16.msra.mxu3 %v1742_v63  ;;  %v1661_v63 = vld [vmem:[#allocation10 + $0x28] sm:$0xf] }
 0x3f5   :  { %v765_v4 = vpop.permute.xlu0 %764  ;;  %v835_v5 = vpop.permute.xlu1 %834 }
 0x3f6   :  { %1631 = vmatmul.msk.bf16.vlgmr.msrb.gmra.mxu1 %vm619_vm9, %v765_v4  ;;  %1634 = vmatmul.msk.bf16.vlgmr.msra.gmra.mxu0 %vm619_vm9, %v835_v5  ;;  %v1746_v4 = vor.u32 %v1940_v2, %v1743_v3  ;;  %v1717_v5 = vld [vmem:[#allocation10 + $0xa0] sm:$0xf]  ;;  %v1922_v2 = vld [vmem:[#allocation10 + $0x34] sm:$0xf0] }
 0x3f8   :  { %1164 = vmatpush.bf16.msrb.mxu0 %v1746_v4  ;;  %v1662_v4 = vor.u32 %v1922_v2, %v1661_v63 }
 0x461   :  { %v698_v6 = vpop.f32.mrf.mxu2  ;;  %v721_v7 = vpop.f32.mrf.mxu3 }
 0x462   :  { %749 = vrot.lane.b32.xlu2 %v698_v6, %s2217_s2  ;;  %753 = vrot.lane.b32.xlu0 %v721_v7, %s2214_s20  ;;  %v1937_v6 = vld [vmem:[#allocation10 + $0xac] sm:$0xf0]  ;;  %v1935_v7 = vld [vmem:[#allocation10 + $0xa4] sm:$0xf] }
 0x463   :  { %v744_v9 = vpop.f32.mrf.mxu0 }
 0x469   :  { %v700_v10 = vpop.f32.mrf.mxu2  ;;  %v723_v12 = vpop.f32.mrf.mxu3 }
 0x46a   :  { %v1719_v10 = vld [vmem:[#allocation10 + $0xb0] sm:$0xf0]  ;;  %v1725_v12 = vld [vmem:[#allocation10 + $0xa8] sm:$0xf] }
 0x46b   :  { %v746_v13 = vpop.f32.mrf.mxu0 }
 0x46c   :  { %v1938_v13 = vld [vmem:[#allocation10 + $0xb4] sm:$0xf0] }
 0x471   :  { %v807_v14 = vpop.f32.mrf.mxu2  ;;  %v830_v16 = vpop.f32.mrf.mxu3 }
 0x472   :  { %858 = vrot.lane.b32.xlu1 %v807_v14, %s2217_s2  ;;  %862 = vrot.lane.b32.xlu2 %v830_v16, %s2214_s20  ;;  %v1722_v14 = vor.u32 %v1935_v7, %v1719_v10  ;;  %v1726_v16 = vor.u32 %v1938_v13, %v1725_v12  ;;  %v1637_v7 = vld [vmem:[#allocation10] sm:$0xf]  ;;  %v1917_v10 = vld [vmem:[#allocation10 + $0xc] sm:$0xf0]  ;;  %v1915_v12 = vld [vmem:[#allocation10 + $0x4] sm:$0xf] }
 0x473   :  { %v781_v17 = vpop.f32.mrf.mxu1  ;;  %v853_v18 = vpop.f32.mrf.mxu0  ;;  %v1639_v13 = vld [vmem:[#allocation10 + $0x10] sm:$0xf0] }
 0x474   :  { %866 = vrot.lane.b32.xlu0 %v853_v18, %s2218_s1  ;;  %v1727_v18 = vld [vmem:[#allocation10 + $0xb8] sm:$0xf0]  ;;  %1151 = vmatpush.bf16.msra.mxu3 %v1726_v16  ;;  %v1642_v16 = vor.u32 %v1915_v12, %v1639_v13  ;;  %v1965_v12 = vld [vmem:[#allocation11 + $0x90] sm:$0xff]  ;;  %v1947_v13 = vld [vmem:[#allocation11] sm:$0xff] }
 0x479   :  { %v809_v19 = vpop.f32.mrf.mxu2  ;;  %v832_v20 = vpop.f32.mrf.mxu3 }
 0x47a   :  { %757 = vrot.lane.b32.xlu1 %v744_v9, %s2218_s1  ;;  %v1718_v9 = vor.u32 %v1937_v6, %v1717_v5  ;;  %v1701_v20 = vld [vmem:[#allocation10 + $0x80] sm:$0xf]  ;;  %v1920_v5 = vld [vmem:[#allocation10 + $0x2c] sm:$0xf]  ;;  %v1663_v6 = vld [vmem:[#allocation10 + $0x38] sm:$0xf0] }
 0x47b   :  { %v783_v21 = vpop.f32.mrf.mxu1  ;;  %v855_v22 = vpop.f32.mrf.mxu0 }
 0x47c   :  { %1123 = vmatpush.bf16.msra.mxu1 %v1718_v9  ;;  %v1933_v21 = vld [vmem:[#allocation10 + $0x8c] sm:$0xf0]  ;;  %v1931_v22 = vld [vmem:[#allocation10 + $0x84] sm:$0xf]  ;;  %v1666_v9 = vor.u32 %v1920_v5, %v1663_v6 }
 0x47d   :  { %v1967_v5 = vld [vmem:[#allocation11 + $0xa0] sm:$0xff]  ;;  %v1949_v6 = vld [vmem:[#allocation11 + $0x10] sm:$0xff] }
 0x4bc   :  { %v750_v23 = vpop.permute.xlu2 %749 }
 0x4bd   :  { %v760_v32 = vsel %vm402_vm7, %v669_v15, %v750_v23  ;;  %v1735_v15 = vld [vmem:[#allocation10 + $0xd0] sm:$0xf0]  ;;  %v1702_v23 = vor.u32 %v1933_v21, %v1701_v20 }
 0x4be   :  { %v1738_v62 = vor.u32 %v1939_v58, %v1735_v15  ;;  %v1682_v58 = vor.u32 %v1924_v11, %v1679_v57  ;;  %v1921_v15 = vld [vmem:[#allocation10 + $0x2c] sm:$0xf0] }
 0x4bf   :  { %1124 = vmatpush.bf16.msra.mxu1 %v1702_v23  ;;  %v1654_v61 = vor.u32 %v1921_v15, %v1653_v59 }
 0x4c0   :  { %1136 = vmatpush.bf16.msra.mxu2 %v1738_v62  ;;  %v1655_v62 = vld [vmem:[#allocation10 + $0x30] sm:$0xf0] }
 0x4c1   :  { %v1658_v3 = vor.u32 %v1919_v60, %v1655_v62 }
 0x4c4   :  { %1137 = vmatpush.bf16.msra.mxu2 %v1722_v14  ;;  %v1638_v14 = vor.u32 %v1917_v10, %v1637_v7  ;;  %v1973_v7 = vld [vmem:[#allocation11 + $0xd0] sm:$0xff]  ;;  %v1972_v10 = vld [vmem:[#allocation11 + $0xc8] sm:$0xff] }
 0x4cc   :  { %v863_v26 = vpop.permute.xlu2 %862 }
 0x4d4   :  { %v754_v24 = vpop.permute.xlu0 %753 }
 0x4d5   :  { %v761_v33 = vsel %vm632_vm15, %v760_v32, %v754_v24  ;;  %v1703_v24 = vld [vmem:[#allocation10 + $0x90] sm:$0xf0] }
 0x4e4   :  { %v859_v25 = vpop.permute.xlu1 %858 }
 0x4e5   :  { %v869_v27 = vsel %vm402_vm7, %v781_v17, %v859_v25  ;;  %v1936_v17 = vld [vmem:[#allocation10 + $0xac] sm:$0xf]  ;;  %v1709_v25 = vld [vmem:[#allocation10 + $0x88] sm:$0xf] }
 0x4e6   :  { %v867_v28 = vpop.permute.xlu0 %866  ;;  %v870_v29 = vsel %vm632_vm15, %v869_v27, %v863_v26  ;;  %v1730_v19 = vor.u32 %v1936_v17, %v1727_v18  ;;  %v1934_v26 = vld [vmem:[#allocation10 + $0x94] sm:$0xf0]  ;;  %v1706_v27 = vor.u32 %v1931_v22, %v1703_v24  ;;  %v1645_v17 = vld [vmem:[#allocation10 + $0x8] sm:$0xf]  ;;  %v1647_v22 = vld [vmem:[#allocation10 + $0x18] sm:$0xf0] }
 0x4e7   :  { %v871_v30 = vsel %vm762_vm0, %v870_v29, %v867_v28  ;;  %v1710_v28 = vor.u32 %v1934_v26, %v1709_v25  ;;  %v1932_v29 = vld [vmem:[#allocation10 + $0x8c] sm:$0xf]  ;;  %v1918_v18 = vld [vmem:[#allocation10 + $0x14] sm:$0xf0] }
 0x4e8   :  { %v2419_v31 = vadd.f32 %v871_v30, %v2307_v1  ;;  %1165 = vmatpush.bf16.msrb.mxu0 %v1730_v19  ;;  %v1711_v30 = vld [vmem:[#allocation10 + $0x98] sm:$0xf0]  ;;  %1138 = vmatpush.bf16.msra.mxu2 %v1706_v27  ;;  %v1916_v19 = vld [vmem:[#allocation10 + $0xc] sm:$0xf]  ;;  %v1646_v21 = vor.u32 %v1918_v18, %v1645_v17  ;;  %v1955_v18 = vld [vmem:[#allocation11 + $0x40] sm:$0xff] }
 0x4e9   :  { %v1714_v32 = vor.u32 %v1932_v29, %v1711_v30  ;;  %1152 = vmatpush.bf16.msra.mxu3 %v1710_v28  ;;  %v1650_v24 = vor.u32 %v1916_v19, %v1647_v22  ;;  %v1954_v27 = vld [vmem:[#allocation11 + $0x38] sm:$0xff]  ;;  %v1964_v17 = vld [vmem:[#allocation11 + $0x88] sm:$0xff]  ;;  %v1963_v19 = vld [vmem:[#allocation11 + $0x80] sm:$0xff] }
 0x4ea   :  { %876 = vadd.xlane.f32.xlu1 %v2419_v31  ;;  %v1978_v28 = vld [vmem:[#allocation11 + $0xf8] sm:$0xff]  ;;  %v951_v22 = vld [vmem:[%s2468_s6] sm:$0xf] }
 0x4eb   :  { %v1962_v30 = vld [vmem:[#allocation11 + $0x78] sm:$0xff] }
 0x4ec   :  { %v758_v34 = vpop.permute.xlu1 %757  ;;  %1166 = vmatpush.bf16.msrb.mxu0 %v1714_v32  ;;  %v1970_v32 = vld [vmem:[#allocation11 + $0xb8] sm:$0xff] }
 0x4ed   :  { %v763_v35 = vsel %vm762_vm0, %v761_v33, %v758_v34  ;;  %v1685_v33 = vld [vmem:[#allocation10 + $0x60] sm:$0xf]  ;;  %v1929_v34 = vld [vmem:[#allocation10 + $0x6c] sm:$0xf0] }
 0x4ee   :  { %v2425_v36 = vadd.f32 %v763_v35, %v2304_v0  ;;  %v1927_v35 = vld [vmem:[#allocation10 + $0x64] sm:$0xf] }
 0x4f0   :  { %874 = vadd.xlane.f32.xlu2 %v2425_v36  ;;  %1167 = vmatpush.bf16.msrb.mxu0 %v1698_v45 }
 0x4f4   :  { %1168 = vmatpush.bf16.msrb.mxu0 %v1682_v58 }
 0x4f8   :  { %1169 = vmatpush.bf16.msrb.mxu0 %v1666_v9  ;;  %v1966_v9 = vld [vmem:[#allocation11 + $0x98] sm:$0xff] }
 0x4fc   :  { %1170 = vmatpush.bf16.msrb.mxu0 %v1650_v24  ;;  %v956_v24 = vperm.slane %v951_v22, 3 }
 0x500   :  { %1483 = vmatpush.bf16.msra.mxu0 %v1978_v28 }
 0x55d   :  { %v877_v37 = vpop.xlane.xlu1 %876 }
 0x55e   :  { %v879_v38 = vmul.f32 %v877_v37, %v2310_v8  ;;  %v1686_v37 = vor.u32 %v1929_v34, %v1685_v33  ;;  %v1953_v33 = vld [vmem:[#allocation11 + $0x30] sm:$0xff] }
 0x55f   :  { %v1977_v34 = vld [vmem:[#allocation11 + $0xf0] sm:$0xff] }
 0x560   :  { %v2430_v39 = vsub.f32 %v2419_v31, %v879_v38  ;;  %v1687_v38 = vld [vmem:[#allocation10 + $0x70] sm:$0xf0]  ;;  %1125 = vmatpush.bf16.msra.mxu1 %v1686_v37  ;;  %1484 = vmatpush.bf16.msra.mxu0 %v1977_v34  ;;  %v954_v34 = vperm.slane %v951_v22, 1 }
 0x561   :  { %v1961_v37 = vld [vmem:[#allocation11 + $0x70] sm:$0xff] }
 0x562   :  { %v883_v1 = vmul.f32 %v2430_v39, %v2430_v39 }
 0x563   :  { %v875_v40 = vpop.xlane.xlu2 %874 }
 0x564   :  { %v878_v41 = vmul.f32 %v875_v40, %v2310_v8  ;;  %886 = vadd.xlane.f32.xlu2 %v883_v1  ;;  %v1693_v1 = vld [vmem:[#allocation10 + $0x68] sm:$0xf]  ;;  %v1930_v40 = vld [vmem:[#allocation10 + $0x74] sm:$0xf0]  ;;  %1126 = vmatpush.bf16.msra.mxu1 %v1670_v50 }
 0x566   :  { %v2436_v42 = vsub.f32 %v2425_v36, %v878_v41  ;;  %v1690_v41 = vor.u32 %v1927_v35, %v1687_v38  ;;  %v1969_v38 = vld [vmem:[#allocation11 + $0xb0] sm:$0xff] }
 0x568   :  { %v882_v0 = vmul.f32 %v2436_v42, %v2436_v42  ;;  %1139 = vmatpush.bf16.msra.mxu2 %v1690_v41  ;;  %1127 = vmatpush.bf16.msra.mxu1 %v1654_v61  ;;  %v1952_v41 = vld [vmem:[#allocation11 + $0x28] sm:$0xff] }
 0x56a   :  { %884 = vadd.xlane.f32.xlu0 %v882_v0  ;;  %v1694_v0 = vor.u32 %v1930_v40, %v1693_v1 }
 0x56c   :  { %1153 = vmatpush.bf16.msra.mxu3 %v1694_v0  ;;  %1140 = vmatpush.bf16.msra.mxu2 %v1674_v55  ;;  %v1976_v0 = vld [vmem:[#allocation11 + $0xe8] sm:$0xff]  ;;  %v1950_v55 = vld [vmem:[#allocation11 + $0x18] sm:$0xff] }
 0x56d   :  { %1128 = vmatpush.bf16.msra.mxu1 %v1638_v14  ;;  %1485 = vmatpush.bf16.msra.mxu0 %v1976_v0  ;;  %v1971_v14 = vld [vmem:[#allocation11 + $0xc0] sm:$0xff] }
 0x570   :  { %1154 = vmatpush.bf16.msra.mxu3 %v1678_v56  ;;  %1141 = vmatpush.bf16.msra.mxu2 %v1658_v3  ;;  %v1974_v56 = vld [vmem:[#allocation11 + $0xd8] sm:$0xff] }
 0x571   :  { %1441 = vmatpush.bf16.msrb.mxu1 %v1954_v27  ;;  %1486 = vmatpush.bf16.msra.mxu0 %v1975_v47  ;;  %v2009_v47 = vld [vmem:[%s2470_s8] ss:$0 sm:$0xff] }
 0x574   :  { %1155 = vmatpush.bf16.msra.mxu3 %v1662_v4  ;;  %1142 = vmatpush.bf16.msra.mxu2 %v1642_v16  ;;  %v1956_v16 = vld [vmem:[#allocation11 + $0x48] sm:$0xff] }
 0x575   :  { %1442 = vmatpush.bf16.msrb.mxu1 %v1953_v33  ;;  %1487 = vmatpush.bf16.msra.mxu0 %v1974_v56 }
 0x578   :  { %1156 = vmatpush.bf16.msra.mxu3 %v1646_v21  ;;  %1455 = vmatpush.bf16.msrb.mxu2 %v1962_v30 }
 0x579   :  { %1443 = vmatpush.bf16.msrb.mxu1 %v1952_v41  ;;  %1488 = vmatpush.bf16.msra.mxu0 %v1973_v7 }
 0x57c   :  { %1469 = vmatpush.bf16.msrb.mxu3 %v1970_v32  ;;  %1456 = vmatpush.bf16.msrb.mxu2 %v1961_v37  ;;  %v955_v37 = vperm.slane %v951_v22, 2 }
 0x57d   :  { %1444 = vmatpush.bf16.msrb.mxu1 %v1951_v46  ;;  %1489 = vmatpush.bf16.msra.mxu0 %v1972_v10 }
 0x580   :  { %1470 = vmatpush.bf16.msrb.mxu3 %v1969_v38 }
 0x581   :  { %1445 = vmatpush.bf16.msrb.mxu1 %v1950_v55  ;;  %1490 = vmatpush.bf16.msra.mxu0 %v1971_v14 }
 0x584   :  { %1471 = vmatpush.bf16.msrb.mxu3 %v1968_v43 }
 0x585   :  { %1446 = vmatpush.bf16.msrb.mxu1 %v1949_v6 }
 0x588   :  { %1472 = vmatpush.bf16.msrb.mxu3 %v1967_v5 }
 0x58c   :  { %1473 = vmatpush.bf16.msrb.mxu3 %v1966_v9 }
 0x590   :  { %1474 = vmatpush.bf16.msrb.mxu3 %v1965_v12 }
 0x594   :  { %1475 = vmatpush.bf16.msrb.mxu3 %v1964_v17 }
 0x598   :  { %1476 = vmatpush.bf16.msrb.mxu3 %v1963_v19 }
 0x5d7   :  { %v887_v20 = vpop.xlane.xlu2 %886 }
 0x5d8   :  { %v889_v23 = vmul.f32 %v887_v20, %v2310_v8 }
 0x5da   :  { %v891_v25 = vadd.f32 1e-05, %v889_v23  ;;  %v953_v23 = vperm.slane %v951_v22, 0 }
 0x5dc   :  { %2020 = vrsqrt.f32 %v891_v25  ;;  %vm908_vm2 = vweird.f32 %v891_v25 }
 0x5dd   :  { %v885_v26 = vpop.xlane.xlu0 %884 }
 0x5de   :  { %v888_v29 = vmul.f32 %v885_v26, %v2310_v8  ;;  %v1960_v8 = vld [vmem:[#allocation11 + $0x68] sm:$0xff] }
 0x5df   :  { %1457 = vmatpush.bf16.msrb.mxu2 %v1960_v8 }
 0x5e0   :  { %v890_v35 = vadd.f32 1e-05, %v888_v29 }
 0x5e2   :  { %v2021_v1 = vpop.eup %2020  ;;  %2022 = vrsqrt.f32 %v890_v35  ;;  %vm898_vm5 = vweird.f32 %v890_v35 }
 0x5e3   :  { %v903_v40 = vmul.f32 %v2021_v1, %v891_v25  ;;  %vm909_vm1 = vweird.f32 %v2021_v1 }
 0x5e4   :  { %vm910_vm3 = vmor %vm908_vm2, %vm909_vm1 }
 0x5e5   :  { %v904_v44 = vmul.f32 %v2021_v1, %v903_v40 }
 0x5e7   :  { %v905_v45 = vmul.f32 0.5, %v904_v44 }
 0x5e8   :  { %v2023_v48 = vpop.eup %2022 }
 0x5e9   :  { %v906_v50 = vsub.f32 1.5, %v905_v45  ;;  %v893_v51 = vmul.f32 %v2023_v48, %v890_v35  ;;  %vm899_vm4 = vweird.f32 %v2023_v48 }
 0x5ea   :  { %vm900_vm6 = vmor %vm898_vm5, %vm899_vm4 }
 0x5eb   :  { %v907_v52 = vmul.f32 %v2021_v1, %v906_v50  ;;  %v894_v53 = vmul.f32 %v2023_v48, %v893_v51 }
 0x5ed   :  { %v911_v11 = vsel %vm910_vm3, %v2021_v1, %v907_v52  ;;  %v895_v57 = vmul.f32 0.5, %v894_v53 }
 0x5ee   :  { %v913_v59 = vmul.f32 %v911_v11, %v2430_v39  ;;  %v1959_v39 = vld [vmem:[#allocation11 + $0x60] sm:$0xff] }
 0x5ef   :  { %v896_v58 = vsub.f32 1.5, %v895_v57  ;;  %1458 = vmatpush.bf16.msrb.mxu2 %v1959_v39 }
 0x5f0   :  { %v915_v62 = vmul.f32 %v2327_v49, %v913_v59 }
 0x5f1   :  { %v897_v15 = vmul.f32 %v2023_v48, %v896_v58 }
 0x5f2   :  { %v917_v3 = vadd.f32 %v2334_v54, %v915_v62 }
 0x5f3   :  { %v901_v60 = vsel %vm900_vm6, %v2023_v48, %v897_v15 }
 0x5f4   :  { %v912_v61 = vmul.f32 %v901_v60, %v2436_v42  ;;  %v1958_v42 = vld [vmem:[#allocation11 + $0x58] sm:$0xff] }
 0x5f5   :  { %1459 = vmatpush.bf16.msrb.mxu2 %v1958_v42 }
 0x5f6   :  { %v914_v63 = vmul.f32 %v2327_v49, %v912_v61  ;;  %v1948_v49 = vld [vmem:[#allocation11 + $0x8] sm:$0xff] }
 0x5f7   :  { %1447 = vmatpush.bf16.msrb.mxu1 %v1948_v49 }
 0x5f8   :  { %v916_v2 = vadd.f32 %v2334_v54, %v914_v63  ;;  %v1957_v54 = vld [vmem:[#allocation11 + $0x50] sm:$0xff] }
 0x5f9   :  { %1460 = vmatpush.bf16.msrb.mxu2 %v1957_v54 }
 0x5fa   :  { %v918_v4 = vpack.c.bf16 %v917_v3, %v916_v2 }
 0x5fb   :  { %1448 = vmatpush.bf16.msrb.mxu1 %v1947_v13 }
 0x5fc   :  { %1129 = vmatmul.bf16.vlgmr.msra.gmra.mxu1 %v918_v4  ;;  %1143 = vmatmul.bf16.vlgmr.msra.gmra.mxu2 %v918_v4 }
 0x5fd   :  { %1157 = vmatmul.bf16.vlgmr.msra.gmra.mxu3 %v918_v4  ;;  %1171 = vmatmul.bf16.vlgmr.msrb.gmra.mxu0 %v918_v4 }
 0x5fe   :  { %1461 = vmatpush.bf16.msrb.mxu2 %v1956_v16 }
 0x602   :  { %1462 = vmatpush.bf16.msrb.mxu2 %v1955_v18 }
 0x679   :  { %v1130_v20 = vpop.f32.mrf.mxu1 }
 0x67a   :  { %v1172_v21 = vpop.f32.mrf.mxu0  ;;  %v1131_v28 = vadd.f32 %v1130_v20, %v953_v23 }
 0x67b   :  { %v1173_v32 = vadd.f32 %v1172_v21, %v956_v24 }
 0x67f   :  { %v1144_v25 = vpop.f32.mrf.mxu2 }
 0x680   :  { %v1158_v26 = vpop.f32.mrf.mxu3  ;;  %v1145_v40 = vadd.f32 %v1144_v25, %v954_v34 }
 0x681   :  { %v1132_v27 = vpop.f32.mrf.mxu1  ;;  %v1159_v8 = vadd.f32 %v1158_v26, %v955_v37 }
 0x682   :  { %v1133_v29 = vadd.f32 %v1132_v27, %v953_v23  ;;  %v1174_v30 = vpop.f32.mrf.mxu0 }
 0x683   :  { %v1175_v33 = vadd.f32 %v1174_v30, %v956_v24 }
 0x684   :  { %v1177_v35 = vpack.c.bf16 %v1133_v29, %v1131_v28 }
 0x685   :  { %v1180_v38 = vpack.c.bf16 %v1175_v33, %v1173_v32 }
 0x686   :  { %1449 = vmatmul.bf16.vlgmr.msrb.gmra.mxu1 %v1177_v35 }
 0x687   :  { %1491 = vmatmul.bf16.vlgmr.msra.gmra.mxu0 %v1180_v38  ;;  %v1146_v1 = vpop.f32.mrf.mxu2 }
 0x688   :  { %v1147_v41 = vadd.f32 %v1146_v1, %v954_v34  ;;  %v1160_v0 = vpop.f32.mrf.mxu3 }
 0x689   :  { %v1161_v43 = vadd.f32 %v1160_v0, %v955_v37 }
 0x68a   :  { %v1178_v44 = vpack.c.bf16 %v1147_v41, %v1145_v40 }
 0x68b   :  { %v1179_v45 = vpack.c.bf16 %v1161_v43, %v1159_v8 }
 0x68c   :  { %1463 = vmatmul.bf16.vlgmr.msrb.gmra.mxu2 %v1178_v44 }
 0x68d   :  { %1477 = vmatmul.bf16.vlgmr.msrb.gmra.mxu3 %v1179_v45 }
 0x703   :  { %v1450_v46 = vpop.f32.mrf.mxu1 }
 0x704   :  { %v1451_v48 = vadd.f32 %v2009_v47, %v1450_v46  ;;  %v1492_v53 = vpop.f32.mrf.mxu0 }
 0x70b   :  { %v1452_v56 = vpop.f32.mrf.mxu1 }
 0x70c   :  { %v1453_v57 = vadd.f32 %v2009_v47, %v1452_v56  ;;  %v1494_v62 = vpop.f32.mrf.mxu0 }
 0x70f   :  { %v1464_v50 = vpop.f32.mrf.mxu2 }
 0x710   :  { %v1465_v51 = vadd.f32 %v1464_v50, %v1451_v48  ;;  %v1478_v52 = vpop.f32.mrf.mxu3 }
 0x712   :  { %v1479_v55 = vadd.f32 %v1478_v52, %v1465_v51 }
 0x714   :  { %v1493_v11 = vadd.f32 %v1492_v53, %v1479_v55 }
 0x716   :  { %v1497_v58 = vadd.f32 %v1493_v11, %v2425_v36 }
 0x717   :  { %v1466_v59 = vpop.f32.mrf.mxu2 }
 0x718   :  { %1499 = vst [vmem:[#allocation13] sm:$0xff] %v1497_v58  ;;  %v1467_v15 = vadd.f32 %v1466_v59, %v1453_v57  ;;  %v1480_v60 = vpop.f32.mrf.mxu3 }
 0x71a   :  { %v1481_v61 = vadd.f32 %v1480_v60, %v1467_v15 }
 0x71c   :  { %v1495_v63 = vadd.f32 %v1494_v62, %v1481_v61 }
 0x71e   :  { %v1498_v2 = vadd.f32 %v1495_v63, %v2419_v31 }
 0x720   :  { %1500 = vst [vmem:[#allocation13 + $0x8] sm:$0xff] %v1498_v2 }
 0x721   :  { %1513 = dma.vmem_to_hbm [thread:$0]  %s1506_s14, 256, %s1508_s16, [#allocation4], %s2205_s26, %s2205_s26, %s2206_s4  }
 0x722   :  { %2200 = dma.done.wait [#allocation4], 256  }
 0x723   :  { %2201 = vsyncadd [#allocation4], 4294967040 }
 0x724   :  { %1518 = vsyncpa [#allocation3], 1 }
 0x725   :  { %1519 = vsyncpa [#allocation6], 1 }
 0x726   :  { %1520 = vsyncpa [#allocation9], 1 }
 0x727   :  { %1521 = vsyncpa [#allocation12], 1 }
 0x728   :  { %1522 = vsyncpa [#allocation4], 1 }

</bundles_post_ra>
